<compile_context>
chip_gen: v7x
topology: tpu7x:2x2x1
jax: 0.10.0
libtpu: 0.0.40
codegen_flags: <defaults>
</compile_context>

<pallas_src>
import functools

import numpy as np
import jax
import jax.numpy as jnp
from jax import lax
from jax.experimental import pallas as pl
from jax.experimental.pallas import tpu as pltpu


# --------------------------------------------------------------------------
# Pallas kernel: the entire MPN forward (W_i, depth-1 message passing steps,
# atom readout W_o, per-molecule mean pooling).  Bond rows are split into
# even / odd halves so the reverse-bond permutation is a free operand swap;
# the per-atom aggregation is a segment-sum driven by SMEM dest indices.
# --------------------------------------------------------------------------
def mpn_kernel(depth,
               f_atoms_ref,    # (NA, FA)   bf16  atom features (padded)
               f_bonds_e_ref,  # (NBH, FB)  bf16  bond features, even bond rows
               f_bonds_o_ref,  # (NBH, FB)  bf16  bond features, odd bond rows
               dest_e_ref,     # (NBH,)     int32 SMEM  dest atom of even bonds
               dest_o_ref,     # (NBH,)     int32 SMEM  dest atom of odd bonds
               scope_ref,      # (NM, NA)   bf16  0/1 molecule-membership mask
               inv_size_ref,   # (NM, 1)    f32   1/a_size (0 for empty mols)
               wi_ref,         # (FB, HP)   bf16  W_i^T (no bias)
               wh_ref,         # (HP, HP)   bf16  W_h^T (no bias)
               wo_a_ref,       # (FA, HP)   bf16  atom half of W_o^T
               wo_m_ref,       # (HP, HP)   bf16  message half of W_o^T
               bo_ref,         # (1, HP)    f32   W_o bias
               out_ref,        # (NM, HP)   f32
               inp_e_ref, inp_o_ref,        # (NBH, HP) f32 scratch
               msg_e_ref, msg_o_ref,        # (NBH, HP) f32 scratch
               x_e_ref, x_o_ref,            # (NBH, HP) f32 scratch
               a_msg_ref):                  # (NA, HP)  f32 scratch
    f32 = jnp.float32
    bf16 = jnp.bfloat16
    nbh = dest_e_ref.shape[0]

    def mxu(a, b):
        return jnp.dot(a, b, preferred_element_type=f32)

    # input = W_i(f_bonds); message = relu(input)
    wi = wi_ref[...]
    inp_e_ref[...] = mxu(f_bonds_e_ref[...], wi)
    inp_o_ref[...] = mxu(f_bonds_o_ref[...], wi)
    msg_e_ref[...] = jnp.maximum(inp_e_ref[...], 0.0)
    msg_o_ref[...] = jnp.maximum(inp_o_ref[...], 0.0)

    def scatter_a_message():
        # a_message[a] = sum of messages of bonds whose destination atom is a
        # (segment-sum over SMEM dest indices; padding bonds hit atom 0 with
        #  zero messages).  Replaces the dense (NA, NB) count-matrix matmul.
        a_msg_ref[...] = jnp.zeros_like(a_msg_ref)

        def body(j, carry):
            de = dest_e_ref[j]
            do = dest_o_ref[j]
            a_msg_ref[pl.ds(de, 1), :] = (a_msg_ref[pl.ds(de, 1), :]
                                          + msg_e_ref[pl.ds(j, 1), :])
            a_msg_ref[pl.ds(do, 1), :] = (a_msg_ref[pl.ds(do, 1), :]
                                          + msg_o_ref[pl.ds(j, 1), :])
            return carry

        lax.fori_loop(0, nbh, body, 0)

    def depth_body(_, carry):
        scatter_a_message()

        # X[b] = a_message[dest(b)] - message[b].  The chemprop update is
        #   new_msg[b] = relu(inp[b] + W_h (a_message[b2a[b]] - message[rev(b)]))
        #              = relu(inp[b] + W_h X[rev(b)])
        # and rev(b) == b ^ 1, so the rev-gather is the even/odd swap below.
        def gather_body(j, c):
            de = dest_e_ref[j]
            do = dest_o_ref[j]
            x_e_ref[pl.ds(j, 1), :] = (a_msg_ref[pl.ds(de, 1), :]
                                       - msg_e_ref[pl.ds(j, 1), :])
            x_o_ref[pl.ds(j, 1), :] = (a_msg_ref[pl.ds(do, 1), :]
                                       - msg_o_ref[pl.ds(j, 1), :])
            return c

        lax.fori_loop(0, nbh, gather_body, 0)

        wh = wh_ref[...]
        msg_e_ref[...] = jnp.maximum(
            inp_e_ref[...] + mxu(x_o_ref[...].astype(bf16), wh), 0.0)
        msg_o_ref[...] = jnp.maximum(
            inp_o_ref[...] + mxu(x_e_ref[...].astype(bf16), wh), 0.0)
        return carry

    lax.fori_loop(0, depth - 1, depth_body, 0, unroll=True)

    # final aggregation onto atoms + readout
    scatter_a_message()
    atom_hiddens = jnp.maximum(
        mxu(f_atoms_ref[...], wo_a_ref[...])
        + mxu(a_msg_ref[...].astype(bf16), wo_m_ref[...])
        + bo_ref[...],
        0.0)

    # per-molecule mean pooling: bf16 0/1 mask matmul on the MXU (f32 accum),
    # then an exact f32 1/a_size scaling.  Empty / padded molecules have an
    # all-zero mask row == cached_zero_vector.
    pooled = mxu(scope_ref[...], atom_hiddens.astype(bf16))
    out_ref[...] = pooled * inv_size_ref[...]


def mpn_encoder_pallas(depth, kernel_inputs, n_mols, hidden):
    (f_atoms_p, f_bonds_e, f_bonds_o, dest_e, dest_o,
     scope_mask, inv_size, wi_p, wh_p, wo_a_p, wo_m_p, bo_p) = kernel_inputs
    NA, _ = f_atoms_p.shape
    NBH, _ = f_bonds_e.shape
    NM = scope_mask.shape[0]
    HP = wi_p.shape[1]

    vmem = pl.BlockSpec(memory_space=pltpu.MemorySpace.VMEM)
    smem = pl.BlockSpec(memory_space=pltpu.MemorySpace.SMEM)

    scratch = [
        pltpu.VMEM((NBH, HP), jnp.float32),   # inp_e
        pltpu.VMEM((NBH, HP), jnp.float32),   # inp_o
        pltpu.VMEM((NBH, HP), jnp.float32),   # msg_e
        pltpu.VMEM((NBH, HP), jnp.float32),   # msg_o
        pltpu.VMEM((NBH, HP), jnp.float32),   # x_e
        pltpu.VMEM((NBH, HP), jnp.float32),   # x_o
        pltpu.VMEM((NA, HP), jnp.float32),    # a_msg
    ]

    # VMEM budget: actual operand + scratch bytes (with headroom), capped at
    # ~75% of this generation's physical VMEM (v5e/v6e 128 MiB, v7x 64 MiB).
    def nbytes(x):
        return int(np.prod(x.shape)) * int(np.dtype(x.dtype).itemsize)

    needed = (sum(nbytes(x) for x in kernel_inputs
                  if not jnp.issubdtype(x.dtype, jnp.integer))
              + NM * HP * 4                       # output
              + (6 * NBH + NA) * HP * 4)          # scratch
    try:
        phys = int(pltpu.get_tpu_info().vmem_capacity_bytes)
    except Exception:
        phys = 64 * 1024 * 1024
    vmem_limit = int(min(max(needed * 3 // 2, 8 * 1024 * 1024), phys * 3 // 4))

    out = pl.pallas_call(
        functools.partial(mpn_kernel, depth),
        out_shape=jax.ShapeDtypeStruct((NM, HP), jnp.float32),
        in_specs=[vmem, vmem, vmem, smem, smem, vmem, vmem,
                  vmem, vmem, vmem, vmem, vmem],
        out_specs=vmem,
        scratch_shapes=scratch,
        compiler_params=pltpu.CompilerParams(vmem_limit_bytes=vmem_limit),
    )(*kernel_inputs)
    return out[:n_mols, :hidden]


# --------------------------------------------------------------------------
# Pure-JAX reference (gather semantics, mirrors the PyTorch forward exactly)
# --------------------------------------------------------------------------
def mpn_encoder_ref(depth, f_atoms, f_bonds, a2b, b2a, b2revb, a_scope,
                    wi_t, wh_t, wo_t, bo, hidden):
    inp = f_bonds @ wi_t
    message = jax.nn.relu(inp)
    for _ in range(depth - 1):
        nei_a_message = message[a2b]              # (n_atoms, max_nb, H)
        a_message = nei_a_message.sum(axis=1)     # (n_atoms, H)
        rev_message = message[b2revb]
        message = a_message[b2a] - rev_message
        message = message @ wh_t
        message = jax.nn.relu(inp + message)
    a_message = message[a2b].sum(axis=1)
    a_input = jnp.concatenate([f_atoms, a_message], axis=1)
    atom_hiddens = jax.nn.relu(a_input @ wo_t + bo)
    mol_vecs = []
    for a_start, a_size in a_scope:
        if a_size == 0:
            mol_vecs.append(jnp.zeros((hidden,), jnp.float32))
        else:
            mol_vecs.append(atom_hiddens[a_start:a_start + a_size].sum(axis=0)
                            / a_size)
    return jnp.stack(mol_vecs, axis=0)


# --------------------------------------------------------------------------
# Glue: build padded, even/odd-split kernel operands from the graph indices.
# --------------------------------------------------------------------------
def _pad_to(n, m):
    return ((n + m - 1) // m) * m


def build_kernel_inputs(f_atoms, f_bonds, a2b, b2a, b2revb, a_scope,
                        wi_t, wh_t, wo_t, bo, hidden):
    n_atoms, atom_fdim = f_atoms.shape
    n_bonds, bond_fdim = f_bonds.shape
    n_mols = len(a_scope)

    # chemprop bond layout: index 0 is the zero padding bond, real bonds are
    # appended in (forward, reverse) pairs -> rev(b) == b ^ 1 after shifting
    # every bond index up by one (two leading padding rows).
    assert n_bonds % 2 == 1
    assert all(int(b2revb[b]) == b + 1 and int(b2revb[b + 1]) == b
               for b in range(1, n_bonds, 2))

    # destination atom of each bond (the atom whose a2b list contains it)
    dest = np.zeros(n_bonds, np.int64)
    for a in range(1, n_atoms):
        for v in a2b[a]:
            if v > 0:
                dest[int(v)] = a
    # structural property used by the kernel: b2a[b] == dest(rev(b))
    assert all(int(b2a[b]) == int(dest[int(b2revb[b])])
               for b in range(1, n_bonds))

    HP = _pad_to(hidden, 128)
    FA = _pad_to(atom_fdim, 128)
    FB = _pad_to(bond_fdim, 128)
    NA = _pad_to(n_atoms, 16)
    NB = _pad_to(n_bonds + 1, 32)   # +1: extra padding bond so pads pair up
    NM = _pad_to(n_mols, 8)

    # bond features, re-indexed: new_b = old_b + 1 (rows 0,1 = zero padding pair)
    f_bonds_p = np.zeros((NB, FB), np.float32)
    f_bonds_p[2:n_bonds + 1, :bond_fdim] = f_bonds[1:]

    f_atoms_p = np.zeros((NA, FA), np.float32)
    f_atoms_p[:n_atoms, :atom_fdim] = f_atoms

    # destination atom per re-indexed bond (padding bonds -> padding atom 0)
    dest_p = np.zeros(NB, np.int32)
    dest_p[2:n_bonds + 1] = dest[1:]

    # per-molecule 0/1 membership mask (bf16-exact) + f32 mean-pool scaling
    scope_mask = np.zeros((NM, NA), np.float32)
    inv_size = np.zeros((NM, 1), np.float32)
    for i, (s, sz) in enumerate(a_scope):
        if sz > 0:
            scope_mask[i, s:s + sz] = 1.0
            inv_size[i, 0] = 1.0 / sz

    # weights, zero padded to lane-friendly (multiple-of-128) shapes
    wi_p = np.zeros((FB, HP), np.float32)
    wi_p[:bond_fdim, :hidden] = wi_t
    wh_p = np.zeros((HP, HP), np.float32)
    wh_p[:hidden, :hidden] = wh_t
    wo_a_p = np.zeros((FA, HP), np.float32)
    wo_a_p[:atom_fdim, :hidden] = wo_t[:atom_fdim]
    wo_m_p = np.zeros((HP, HP), np.float32)
    wo_m_p[:hidden, :hidden] = wo_t[atom_fdim:]
    bo_p = np.zeros((1, HP), np.float32)
    bo_p[0, :hidden] = bo

    bf = lambda x: jnp.asarray(x, jnp.bfloat16)
    return (bf(f_atoms_p),
            bf(f_bonds_p[0::2]), bf(f_bonds_p[1::2]),
            jnp.asarray(dest_p[0::2], jnp.int32),
            jnp.asarray(dest_p[1::2], jnp.int32),
            bf(scope_mask), jnp.asarray(inv_size, jnp.float32),
            bf(wi_p), bf(wh_p), bf(wo_a_p), bf(wo_m_p),
            jnp.asarray(bo_p, jnp.float32))


def build_graph():
    # 3 small molecules + one empty molecule (exercises cached_zero_vector).
    a_scope = [(1, 4), (5, 3), (8, 2), (0, 0)]
    n_atoms = 10                                   # atom 0 is the padding atom
    edges = [(1, 2), (2, 3), (3, 4), (4, 1),       # mol 0: 4-ring
             (5, 6), (6, 7),                       # mol 1: chain
             (8, 9)]                               # mol 2: single bond
    a2b_lists = [[] for _ in range(n_atoms)]
    b2a = [0]
    b2revb = [0]
    for (x, y) in edges:                           # chemprop bond construction
        b1 = len(b2a)                              # x -> y
        b2 = b1 + 1                                # y -> x
        a2b_lists[y].append(b1)
        b2a.append(x)
        a2b_lists[x].append(b2)
        b2a.append(y)
        b2revb.extend([b2, b1])
    n_bonds = len(b2a)                             # 15 (incl. padding bond 0)
    max_nb = 3
    a2b = np.zeros((n_atoms, max_nb), np.int32)
    for a in range(n_atoms):
        lst = a2b_lists[a][:max_nb]
        a2b[a, :len(lst)] = lst
    return (a2b, np.asarray(b2a, np.int32), np.asarray(b2revb, np.int32),
            a_scope, n_atoms, n_bonds)


if __name__ == "__main__":
    atom_fdim = 16
    bond_only_fdim = 8
    bond_fdim = bond_only_fdim + atom_fdim      # chemprop: bond feats include atom feats
    hidden = 32
    depth = 3

    a2b, b2a, b2revb, a_scope, n_atoms, n_bonds = build_graph()
    n_mols = len(a_scope)

    key = jax.random.PRNGKey(0)
    k_fa, k_fb, k_wi, k_wh, k_wo, k_bo = jax.random.split(key, 6)

    # Shared bf16 parameter rounding (kernel runs the MXU in bf16; the f32
    # reference consumes the same rounded parameters so the check isolates
    # the kernel's mixed-precision accumulation).
    rnd = lambda x: x.astype(jnp.bfloat16).astype(jnp.float32)

    f_atoms = rnd(jax.random.normal(k_fa, (n_atoms, atom_fdim), jnp.float32))
    f_atoms = f_atoms.at[0].set(0.0)             # padding atom row is zero
    f_bonds = rnd(jax.random.normal(k_fb, (n_bonds, bond_fdim), jnp.float32))
    f_bonds = f_bonds.at[0].set(0.0)             # padding bond row is zero

    # deterministic parameters (ConcreteDropout-wrapped Linears, forward math only)
    wi_t = rnd(0.2 * jax.random.normal(k_wi, (bond_fdim, hidden), jnp.float32))
    wh_t = rnd(0.2 * jax.random.normal(k_wh, (hidden, hidden), jnp.float32))
    wo_t = rnd(0.2 * jax.random.normal(k_wo, (atom_fdim + hidden, hidden),
                                       jnp.float32))
    bo = 0.1 * jax.random.normal(k_bo, (hidden,), jnp.float32)   # stays f32

    kernel_inputs = build_kernel_inputs(
        np.asarray(f_atoms), np.asarray(f_bonds), a2b, b2a, b2revb, a_scope,
        np.asarray(wi_t), np.asarray(wh_t), np.asarray(wo_t), np.asarray(bo),
        hidden)

    mol_vecs = mpn_encoder_pallas(depth, kernel_inputs, n_mols, hidden)
    mol_vecs = jax.block_until_ready(mol_vecs)

    ref = mpn_encoder_ref(depth, f_atoms, f_bonds, jnp.asarray(a2b),
                          jnp.asarray(b2a), jnp.asarray(b2revb), a_scope,
                          wi_t, wh_t, wo_t, bo, hidden)
    ref = jax.block_until_ready(ref)

    np.testing.assert_allclose(np.asarray(mol_vecs), np.asarray(ref),
                               rtol=3e-2, atol=3e-2)
    assert mol_vecs.shape == (n_mols, hidden)
    print("KERNEL_OK")
</pallas_src>

<mosaic_0001>
module attributes {stable_mosaic.version = 11 : i64} {
  func.func @mpn_kernel(%arg0: memref<16x128xbf16, #tpu.memory_space<vmem>>, %arg1: memref<16x128xbf16, #tpu.memory_space<vmem>>, %arg2: memref<16x128xbf16, #tpu.memory_space<vmem>>, %arg3: memref<16xi32, #tpu.memory_space<smem>>, %arg4: memref<16xi32, #tpu.memory_space<smem>>, %arg5: memref<8x16xbf16, #tpu.memory_space<vmem>>, %arg6: memref<8x1xf32, #tpu.memory_space<vmem>>, %arg7: memref<128x128xbf16, #tpu.memory_space<vmem>>, %arg8: memref<128x128xbf16, #tpu.memory_space<vmem>>, %arg9: memref<128x128xbf16, #tpu.memory_space<vmem>>, %arg10: memref<128x128xbf16, #tpu.memory_space<vmem>>, %arg11: memref<1x128xf32, #tpu.memory_space<vmem>>, %arg12: memref<8x128xf32, #tpu.memory_space<vmem>>, %arg13: memref<16x128xf32, #tpu.memory_space<vmem>>, %arg14: memref<16x128xf32, #tpu.memory_space<vmem>>, %arg15: memref<16x128xf32, #tpu.memory_space<vmem>>, %arg16: memref<16x128xf32, #tpu.memory_space<vmem>>, %arg17: memref<16x128xf32, #tpu.memory_space<vmem>>, %arg18: memref<16x128xf32, #tpu.memory_space<vmem>>, %arg19: memref<16x128xf32, #tpu.memory_space<vmem>>) attributes {dimension_semantics = [], scalar_prefetch = 0 : i64, scratch_operands = 7 : i64, tpu.core_type = #tpu.core_type<tc>} {
    %c0 = arith.constant 0 : index
    %c0_0 = arith.constant 0 : index
    %0 = vector.load %arg7[%c0, %c0_0] : memref<128x128xbf16, #tpu.memory_space<vmem>>, vector<128x128xbf16>
    %c0_1 = arith.constant 0 : index
    %c0_2 = arith.constant 0 : index
    %1 = vector.load %arg1[%c0_1, %c0_2] : memref<16x128xbf16, #tpu.memory_space<vmem>>, vector<16x128xbf16>
    %cst = arith.constant dense<0.000000e+00> : vector<16x128xf32>
    %2 = tpu.matmul %1, %0, %cst {dimension_numbers = #tpu.dot_dimension_numbers<[1], [0], [0], [1], [0, 0, 1, 1], [], []>} : vector<16x128xbf16>, vector<128x128xbf16>, vector<16x128xf32> -> vector<16x128xf32>
    %c0_3 = arith.constant 0 : index
    %c0_4 = arith.constant 0 : index
    %3 = vector.load %arg13[%c0_3, %c0_4] : memref<16x128xf32, #tpu.memory_space<vmem>>, vector<16x128xf32>
    tpu.vector_store %arg13[%c0_3, %c0_4], %2 {strides = array<i32>} : memref<16x128xf32, #tpu.memory_space<vmem>>, vector<16x128xf32>,
    %c0_5 = arith.constant 0 : index
    %c0_6 = arith.constant 0 : index
    %4 = vector.load %arg2[%c0_5, %c0_6] : memref<16x128xbf16, #tpu.memory_space<vmem>>, vector<16x128xbf16>
    %cst_7 = arith.constant dense<0.000000e+00> : vector<16x128xf32>
    %5 = tpu.matmul %4, %0, %cst_7 {dimension_numbers = #tpu.dot_dimension_numbers<[1], [0], [0], [1], [0, 0, 1, 1], [], []>} : vector<16x128xbf16>, vector<128x128xbf16>, vector<16x128xf32> -> vector<16x128xf32>
    %c0_8 = arith.constant 0 : index
    %c0_9 = arith.constant 0 : index
    %6 = vector.load %arg14[%c0_8, %c0_9] : memref<16x128xf32, #tpu.memory_space<vmem>>, vector<16x128xf32>
    tpu.vector_store %arg14[%c0_8, %c0_9], %5 {strides = array<i32>} : memref<16x128xf32, #tpu.memory_space<vmem>>, vector<16x128xf32>,
    %c0_10 = arith.constant 0 : index
    %c0_11 = arith.constant 0 : index
    %7 = vector.load %arg13[%c0_10, %c0_11] : memref<16x128xf32, #tpu.memory_space<vmem>>, vector<16x128xf32>
    %cst_12 = arith.constant 0.000000e+00 : f32
    %8 = vector.broadcast %cst_12 : f32 to vector<16x128xf32>
    %9 = arith.maximumf %7, %8 : vector<16x128xf32>
    %c0_13 = arith.constant 0 : index
    %c0_14 = arith.constant 0 : index
    %10 = vector.load %arg15[%c0_13, %c0_14] : memref<16x128xf32, #tpu.memory_space<vmem>>, vector<16x128xf32>
    tpu.vector_store %arg15[%c0_13, %c0_14], %9 {strides = array<i32>} : memref<16x128xf32, #tpu.memory_space<vmem>>, vector<16x128xf32>,
    %c0_15 = arith.constant 0 : index
    %c0_16 = arith.constant 0 : index
    %11 = vector.load %arg14[%c0_15, %c0_16] : memref<16x128xf32, #tpu.memory_space<vmem>>, vector<16x128xf32>
    %cst_17 = arith.constant 0.000000e+00 : f32
    %12 = vector.broadcast %cst_17 : f32 to vector<16x128xf32>
    %13 = arith.maximumf %11, %12 : vector<16x128xf32>
    %c0_18 = arith.constant 0 : index
    %c0_19 = arith.constant 0 : index
    %14 = vector.load %arg16[%c0_18, %c0_19] : memref<16x128xf32, #tpu.memory_space<vmem>>, vector<16x128xf32>
    tpu.vector_store %arg16[%c0_18, %c0_19], %13 {strides = array<i32>} : memref<16x128xf32, #tpu.memory_space<vmem>>, vector<16x128xf32>,
    %c0_i32 = arith.constant 0 : i32
    %cst_20 = arith.constant 0.000000e+00 : f32
    %15 = vector.broadcast %cst_20 : f32 to vector<16x128xf32>
    %c0_21 = arith.constant 0 : index
    %c0_22 = arith.constant 0 : index
    %16 = vector.load %arg19[%c0_21, %c0_22] : memref<16x128xf32, #tpu.memory_space<vmem>>, vector<16x128xf32>
    tpu.vector_store %arg19[%c0_21, %c0_22], %15 {strides = array<i32>} : memref<16x128xf32, #tpu.memory_space<vmem>>, vector<16x128xf32>,
    %c0_i32_23 = arith.constant 0 : i32
    %c16_i32 = arith.constant 16 : i32
    %17 = arith.addi %c0_i32_23, %c16_i32 : i32
    %c1_i32 = arith.constant 1 : i32
    scf.for %arg20 = %c0_i32_23 to %17 step %c1_i32  : i32 {
      %80 = arith.index_cast %arg20 : i32 to index
      %81 = memref.load %arg3[%80] : memref<16xi32, #tpu.memory_space<smem>>
      %82 = arith.index_cast %arg20 : i32 to index
      %83 = memref.load %arg4[%82] : memref<16xi32, #tpu.memory_space<smem>>
      %84 = arith.index_cast %81 : i32 to index
      %c0_104 = arith.constant 0 : index
      %85 = vector.load %arg19[%84, %c0_104] : memref<16x128xf32, #tpu.memory_space<vmem>>, vector<1x128xf32>
      %86 = arith.index_cast %arg20 : i32 to index
      %c0_105 = arith.constant 0 : index
      %87 = vector.load %arg15[%86, %c0_105] : memref<16x128xf32, #tpu.memory_space<vmem>>, vector<1x128xf32>
      %88 = arith.addf %85, %87 : vector<1x128xf32>
      %89 = arith.index_cast %81 : i32 to index
      %c0_106 = arith.constant 0 : index
      %90 = vector.load %arg19[%89, %c0_106] : memref<16x128xf32, #tpu.memory_space<vmem>>, vector<1x128xf32>
      tpu.vector_store %arg19[%89, %c0_106], %88 {strides = array<i32>} : memref<16x128xf32, #tpu.memory_space<vmem>>, vector<1x128xf32>,
      %91 = arith.index_cast %83 : i32 to index
      %c0_107 = arith.constant 0 : index
      %92 = vector.load %arg19[%91, %c0_107] : memref<16x128xf32, #tpu.memory_space<vmem>>, vector<1x128xf32>
      %93 = arith.index_cast %arg20 : i32 to index
      %c0_108 = arith.constant 0 : index
      %94 = vector.load %arg16[%93, %c0_108] : memref<16x128xf32, #tpu.memory_space<vmem>>, vector<1x128xf32>
      %95 = arith.addf %92, %94 : vector<1x128xf32>
      %96 = arith.index_cast %83 : i32 to index
      %c0_109 = arith.constant 0 : index
      %97 = vector.load %arg19[%96, %c0_109] : memref<16x128xf32, #tpu.memory_space<vmem>>, vector<1x128xf32>
      tpu.vector_store %arg19[%96, %c0_109], %95 {strides = array<i32>} : memref<16x128xf32, #tpu.memory_space<vmem>>, vector<1x128xf32>,
    }
    %c16_i32_24 = arith.constant 16 : i32
    %c0_i32_25 = arith.constant 0 : i32
    %c16_i32_26 = arith.constant 16 : i32
    %18 = arith.addi %c0_i32_25, %c16_i32_26 : i32
    %c1_i32_27 = arith.constant 1 : i32
    scf.for %arg20 = %c0_i32_25 to %18 step %c1_i32_27  : i32 {
      %80 = arith.index_cast %arg20 : i32 to index
      %81 = memref.load %arg3[%80] : memref<16xi32, #tpu.memory_space<smem>>
      %82 = arith.index_cast %arg20 : i32 to index
      %83 = memref.load %arg4[%82] : memref<16xi32, #tpu.memory_space<smem>>
      %84 = arith.index_cast %81 : i32 to index
      %c0_104 = arith.constant 0 : index
      %85 = vector.load %arg19[%84, %c0_104] : memref<16x128xf32, #tpu.memory_space<vmem>>, vector<1x128xf32>
      %86 = arith.index_cast %arg20 : i32 to index
      %c0_105 = arith.constant 0 : index
      %87 = vector.load %arg15[%86, %c0_105] : memref<16x128xf32, #tpu.memory_space<vmem>>, vector<1x128xf32>
      %88 = arith.subf %85, %87 : vector<1x128xf32>
      %89 = arith.index_cast %arg20 : i32 to index
      %c0_106 = arith.constant 0 : index
      %90 = vector.load %arg17[%89, %c0_106] : memref<16x128xf32, #tpu.memory_space<vmem>>, vector<1x128xf32>
      tpu.vector_store %arg17[%89, %c0_106], %88 {strides = array<i32>} : memref<16x128xf32, #tpu.memory_space<vmem>>, vector<1x128xf32>,
      %91 = arith.index_cast %83 : i32 to index
      %c0_107 = arith.constant 0 : index
      %92 = vector.load %arg19[%91, %c0_107] : memref<16x128xf32, #tpu.memory_space<vmem>>, vector<1x128xf32>
      %93 = arith.index_cast %arg20 : i32 to index
      %c0_108 = arith.constant 0 : index
      %94 = vector.load %arg16[%93, %c0_108] : memref<16x128xf32, #tpu.memory_space<vmem>>, vector<1x128xf32>
      %95 = arith.subf %92, %94 : vector<1x128xf32>
      %96 = arith.index_cast %arg20 : i32 to index
      %c0_109 = arith.constant 0 : index
      %97 = vector.load %arg18[%96, %c0_109] : memref<16x128xf32, #tpu.memory_space<vmem>>, vector<1x128xf32>
      tpu.vector_store %arg18[%96, %c0_109], %95 {strides = array<i32>} : memref<16x128xf32, #tpu.memory_space<vmem>>, vector<1x128xf32>,
    }
    %c16_i32_28 = arith.constant 16 : i32
    %c0_29 = arith.constant 0 : index
    %c0_30 = arith.constant 0 : index
    %19 = vector.load %arg8[%c0_29, %c0_30] : memref<128x128xbf16, #tpu.memory_space<vmem>>, vector<128x128xbf16>
    %c0_31 = arith.constant 0 : index
    %c0_32 = arith.constant 0 : index
    %20 = vector.load %arg13[%c0_31, %c0_32] : memref<16x128xf32, #tpu.memory_space<vmem>>, vector<16x128xf32>
    %c0_33 = arith.constant 0 : index
    %c0_34 = arith.constant 0 : index
    %21 = vector.load %arg18[%c0_33, %c0_34] : memref<16x128xf32, #tpu.memory_space<vmem>>, vector<16x128xf32>
    %22 = arith.truncf %21 : vector<16x128xf32> to vector<16x128xbf16>
    %cst_35 = arith.constant dense<0.000000e+00> : vector<16x128xf32>
    %23 = tpu.matmul %22, %19, %cst_35 {dimension_numbers = #tpu.dot_dimension_numbers<[1], [0], [0], [1], [0, 0, 1, 1], [], []>} : vector<16x128xbf16>, vector<128x128xbf16>, vector<16x128xf32> -> vector<16x128xf32>
    %24 = arith.addf %20, %23 : vector<16x128xf32>
    %cst_36 = arith.constant 0.000000e+00 : f32
    %25 = vector.broadcast %cst_36 : f32 to vector<16x128xf32>
    %26 = arith.maximumf %24, %25 : vector<16x128xf32>
    %c0_37 = arith.constant 0 : index
    %c0_38 = arith.constant 0 : index
    %27 = vector.load %arg15[%c0_37, %c0_38] : memref<16x128xf32, #tpu.memory_space<vmem>>, vector<16x128xf32>
    tpu.vector_store %arg15[%c0_37, %c0_38], %26 {strides = array<i32>} : memref<16x128xf32, #tpu.memory_space<vmem>>, vector<16x128xf32>,
    %c0_39 = arith.constant 0 : index
    %c0_40 = arith.constant 0 : index
    %28 = vector.load %arg14[%c0_39, %c0_40] : memref<16x128xf32, #tpu.memory_space<vmem>>, vector<16x128xf32>
    %c0_41 = arith.constant 0 : index
    %c0_42 = arith.constant 0 : index
    %29 = vector.load %arg17[%c0_41, %c0_42] : memref<16x128xf32, #tpu.memory_space<vmem>>, vector<16x128xf32>
    %30 = arith.truncf %29 : vector<16x128xf32> to vector<16x128xbf16>
    %cst_43 = arith.constant dense<0.000000e+00> : vector<16x128xf32>
    %31 = tpu.matmul %30, %19, %cst_43 {dimension_numbers = #tpu.dot_dimension_numbers<[1], [0], [0], [1], [0, 0, 1, 1], [], []>} : vector<16x128xbf16>, vector<128x128xbf16>, vector<16x128xf32> -> vector<16x128xf32>
    %32 = arith.addf %28, %31 : vector<16x128xf32>
    %cst_44 = arith.constant 0.000000e+00 : f32
    %33 = vector.broadcast %cst_44 : f32 to vector<16x128xf32>
    %34 = arith.maximumf %32, %33 : vector<16x128xf32>
    %c0_45 = arith.constant 0 : index
    %c0_46 = arith.constant 0 : index
    %35 = vector.load %arg16[%c0_45, %c0_46] : memref<16x128xf32, #tpu.memory_space<vmem>>, vector<16x128xf32>
    tpu.vector_store %arg16[%c0_45, %c0_46], %34 {strides = array<i32>} : memref<16x128xf32, #tpu.memory_space<vmem>>, vector<16x128xf32>,
    %c1_i32_47 = arith.constant 1 : i32
    %cst_48 = arith.constant 0.000000e+00 : f32
    %36 = vector.broadcast %cst_48 : f32 to vector<16x128xf32>
    %c0_49 = arith.constant 0 : index
    %c0_50 = arith.constant 0 : index
    %37 = vector.load %arg19[%c0_49, %c0_50] : memref<16x128xf32, #tpu.memory_space<vmem>>, vector<16x128xf32>
    tpu.vector_store %arg19[%c0_49, %c0_50], %36 {strides = array<i32>} : memref<16x128xf32, #tpu.memory_space<vmem>>, vector<16x128xf32>,
    %c0_i32_51 = arith.constant 0 : i32
    %c16_i32_52 = arith.constant 16 : i32
    %38 = arith.addi %c0_i32_51, %c16_i32_52 : i32
    %c1_i32_53 = arith.constant 1 : i32
    scf.for %arg20 = %c0_i32_51 to %38 step %c1_i32_53  : i32 {
      %80 = arith.index_cast %arg20 : i32 to index
      %81 = memref.load %arg3[%80] : memref<16xi32, #tpu.memory_space<smem>>
      %82 = arith.index_cast %arg20 : i32 to index
      %83 = memref.load %arg4[%82] : memref<16xi32, #tpu.memory_space<smem>>
      %84 = arith.index_cast %81 : i32 to index
      %c0_104 = arith.constant 0 : index
      %85 = vector.load %arg19[%84, %c0_104] : memref<16x128xf32, #tpu.memory_space<vmem>>, vector<1x128xf32>
      %86 = arith.index_cast %arg20 : i32 to index
      %c0_105 = arith.constant 0 : index
      %87 = vector.load %arg15[%86, %c0_105] : memref<16x128xf32, #tpu.memory_space<vmem>>, vector<1x128xf32>
      %88 = arith.addf %85, %87 : vector<1x128xf32>
      %89 = arith.index_cast %81 : i32 to index
      %c0_106 = arith.constant 0 : index
      %90 = vector.load %arg19[%89, %c0_106] : memref<16x128xf32, #tpu.memory_space<vmem>>, vector<1x128xf32>
      tpu.vector_store %arg19[%89, %c0_106], %88 {strides = array<i32>} : memref<16x128xf32, #tpu.memory_space<vmem>>, vector<1x128xf32>,
      %91 = arith.index_cast %83 : i32 to index
      %c0_107 = arith.constant 0 : index
      %92 = vector.load %arg19[%91, %c0_107] : memref<16x128xf32, #tpu.memory_space<vmem>>, vector<1x128xf32>
      %93 = arith.index_cast %arg20 : i32 to index
      %c0_108 = arith.constant 0 : index
      %94 = vector.load %arg16[%93, %c0_108] : memref<16x128xf32, #tpu.memory_space<vmem>>, vector<1x128xf32>
      %95 = arith.addf %92, %94 : vector<1x128xf32>
      %96 = arith.index_cast %83 : i32 to index
      %c0_109 = arith.constant 0 : index
      %97 = vector.load %arg19[%96, %c0_109] : memref<16x128xf32, #tpu.memory_space<vmem>>, vector<1x128xf32>
      tpu.vector_store %arg19[%96, %c0_109], %95 {strides = array<i32>} : memref<16x128xf32, #tpu.memory_space<vmem>>, vector<1x128xf32>,
    }
    %c16_i32_54 = arith.constant 16 : i32
    %c0_i32_55 = arith.constant 0 : i32
    %c16_i32_56 = arith.constant 16 : i32
    %39 = arith.addi %c0_i32_55, %c16_i32_56 : i32
    %c1_i32_57 = arith.constant 1 : i32
    scf.for %arg20 = %c0_i32_55 to %39 step %c1_i32_57  : i32 {
      %80 = arith.index_cast %arg20 : i32 to index
      %81 = memref.load %arg3[%80] : memref<16xi32, #tpu.memory_space<smem>>
      %82 = arith.index_cast %arg20 : i32 to index
      %83 = memref.load %arg4[%82] : memref<16xi32, #tpu.memory_space<smem>>
      %84 = arith.index_cast %81 : i32 to index
      %c0_104 = arith.constant 0 : index
      %85 = vector.load %arg19[%84, %c0_104] : memref<16x128xf32, #tpu.memory_space<vmem>>, vector<1x128xf32>
      %86 = arith.index_cast %arg20 : i32 to index
      %c0_105 = arith.constant 0 : index
      %87 = vector.load %arg15[%86, %c0_105] : memref<16x128xf32, #tpu.memory_space<vmem>>, vector<1x128xf32>
      %88 = arith.subf %85, %87 : vector<1x128xf32>
      %89 = arith.index_cast %arg20 : i32 to index
      %c0_106 = arith.constant 0 : index
      %90 = vector.load %arg17[%89, %c0_106] : memref<16x128xf32, #tpu.memory_space<vmem>>, vector<1x128xf32>
      tpu.vector_store %arg17[%89, %c0_106], %88 {strides = array<i32>} : memref<16x128xf32, #tpu.memory_space<vmem>>, vector<1x128xf32>,
      %91 = arith.index_cast %83 : i32 to index
      %c0_107 = arith.constant 0 : index
      %92 = vector.load %arg19[%91, %c0_107] : memref<16x128xf32, #tpu.memory_space<vmem>>, vector<1x128xf32>
      %93 = arith.index_cast %arg20 : i32 to index
      %c0_108 = arith.constant 0 : index
      %94 = vector.load %arg16[%93, %c0_108] : memref<16x128xf32, #tpu.memory_space<vmem>>, vector<1x128xf32>
      %95 = arith.subf %92, %94 : vector<1x128xf32>
      %96 = arith.index_cast %arg20 : i32 to index
      %c0_109 = arith.constant 0 : index
      %97 = vector.load %arg18[%96, %c0_109] : memref<16x128xf32, #tpu.memory_space<vmem>>, vector<1x128xf32>
      tpu.vector_store %arg18[%96, %c0_109], %95 {strides = array<i32>} : memref<16x128xf32, #tpu.memory_space<vmem>>, vector<1x128xf32>,
    }
    %c16_i32_58 = arith.constant 16 : i32
    %c0_59 = arith.constant 0 : index
    %c0_60 = arith.constant 0 : index
    %40 = vector.load %arg8[%c0_59, %c0_60] : memref<128x128xbf16, #tpu.memory_space<vmem>>, vector<128x128xbf16>
    %c0_61 = arith.constant 0 : index
    %c0_62 = arith.constant 0 : index
    %41 = vector.load %arg13[%c0_61, %c0_62] : memref<16x128xf32, #tpu.memory_space<vmem>>, vector<16x128xf32>
    %c0_63 = arith.constant 0 : index
    %c0_64 = arith.constant 0 : index
    %42 = vector.load %arg18[%c0_63, %c0_64] : memref<16x128xf32, #tpu.memory_space<vmem>>, vector<16x128xf32>
    %43 = arith.truncf %42 : vector<16x128xf32> to vector<16x128xbf16>
    %cst_65 = arith.constant dense<0.000000e+00> : vector<16x128xf32>
    %44 = tpu.matmul %43, %40, %cst_65 {dimension_numbers = #tpu.dot_dimension_numbers<[1], [0], [0], [1], [0, 0, 1, 1], [], []>} : vector<16x128xbf16>, vector<128x128xbf16>, vector<16x128xf32> -> vector<16x128xf32>
    %45 = arith.addf %41, %44 : vector<16x128xf32>
    %cst_66 = arith.constant 0.000000e+00 : f32
    %46 = vector.broadcast %cst_66 : f32 to vector<16x128xf32>
    %47 = arith.maximumf %45, %46 : vector<16x128xf32>
    %c0_67 = arith.constant 0 : index
    %c0_68 = arith.constant 0 : index
    %48 = vector.load %arg15[%c0_67, %c0_68] : memref<16x128xf32, #tpu.memory_space<vmem>>, vector<16x128xf32>
    tpu.vector_store %arg15[%c0_67, %c0_68], %47 {strides = array<i32>} : memref<16x128xf32, #tpu.memory_space<vmem>>, vector<16x128xf32>,
    %c0_69 = arith.constant 0 : index
    %c0_70 = arith.constant 0 : index
    %49 = vector.load %arg14[%c0_69, %c0_70] : memref<16x128xf32, #tpu.memory_space<vmem>>, vector<16x128xf32>
    %c0_71 = arith.constant 0 : index
    %c0_72 = arith.constant 0 : index
    %50 = vector.load %arg17[%c0_71, %c0_72] : memref<16x128xf32, #tpu.memory_space<vmem>>, vector<16x128xf32>
    %51 = arith.truncf %50 : vector<16x128xf32> to vector<16x128xbf16>
    %cst_73 = arith.constant dense<0.000000e+00> : vector<16x128xf32>
    %52 = tpu.matmul %51, %40, %cst_73 {dimension_numbers = #tpu.dot_dimension_numbers<[1], [0], [0], [1], [0, 0, 1, 1], [], []>} : vector<16x128xbf16>, vector<128x128xbf16>, vector<16x128xf32> -> vector<16x128xf32>
    %53 = arith.addf %49, %52 : vector<16x128xf32>
    %cst_74 = arith.constant 0.000000e+00 : f32
    %54 = vector.broadcast %cst_74 : f32 to vector<16x128xf32>
    %55 = arith.maximumf %53, %54 : vector<16x128xf32>
    %c0_75 = arith.constant 0 : index
    %c0_76 = arith.constant 0 : index
    %56 = vector.load %arg16[%c0_75, %c0_76] : memref<16x128xf32, #tpu.memory_space<vmem>>, vector<16x128xf32>
    tpu.vector_store %arg16[%c0_75, %c0_76], %55 {strides = array<i32>} : memref<16x128xf32, #tpu.memory_space<vmem>>, vector<16x128xf32>,
    %cst_77 = arith.constant 0.000000e+00 : f32
    %57 = vector.broadcast %cst_77 : f32 to vector<16x128xf32>
    %c0_78 = arith.constant 0 : index
    %c0_79 = arith.constant 0 : index
    %58 = vector.load %arg19[%c0_78, %c0_79] : memref<16x128xf32, #tpu.memory_space<vmem>>, vector<16x128xf32>
    tpu.vector_store %arg19[%c0_78, %c0_79], %57 {strides = array<i32>} : memref<16x128xf32, #tpu.memory_space<vmem>>, vector<16x128xf32>,
    %c0_i32_80 = arith.constant 0 : i32
    %c16_i32_81 = arith.constant 16 : i32
    %59 = arith.addi %c0_i32_80, %c16_i32_81 : i32
    %c1_i32_82 = arith.constant 1 : i32
    scf.for %arg20 = %c0_i32_80 to %59 step %c1_i32_82  : i32 {
      %80 = arith.index_cast %arg20 : i32 to index
      %81 = memref.load %arg3[%80] : memref<16xi32, #tpu.memory_space<smem>>
      %82 = arith.index_cast %arg20 : i32 to index
      %83 = memref.load %arg4[%82] : memref<16xi32, #tpu.memory_space<smem>>
      %84 = arith.index_cast %81 : i32 to index
      %c0_104 = arith.constant 0 : index
      %85 = vector.load %arg19[%84, %c0_104] : memref<16x128xf32, #tpu.memory_space<vmem>>, vector<1x128xf32>
      %86 = arith.index_cast %arg20 : i32 to index
      %c0_105 = arith.constant 0 : index
      %87 = vector.load %arg15[%86, %c0_105] : memref<16x128xf32, #tpu.memory_space<vmem>>, vector<1x128xf32>
      %88 = arith.addf %85, %87 : vector<1x128xf32>
      %89 = arith.index_cast %81 : i32 to index
      %c0_106 = arith.constant 0 : index
      %90 = vector.load %arg19[%89, %c0_106] : memref<16x128xf32, #tpu.memory_space<vmem>>, vector<1x128xf32>
      tpu.vector_store %arg19[%89, %c0_106], %88 {strides = array<i32>} : memref<16x128xf32, #tpu.memory_space<vmem>>, vector<1x128xf32>,
      %91 = arith.index_cast %83 : i32 to index
      %c0_107 = arith.constant 0 : index
      %92 = vector.load %arg19[%91, %c0_107] : memref<16x128xf32, #tpu.memory_space<vmem>>, vector<1x128xf32>
      %93 = arith.index_cast %arg20 : i32 to index
      %c0_108 = arith.constant 0 : index
      %94 = vector.load %arg16[%93, %c0_108] : memref<16x128xf32, #tpu.memory_space<vmem>>, vector<1x128xf32>
      %95 = arith.addf %92, %94 : vector<1x128xf32>
      %96 = arith.index_cast %83 : i32 to index
      %c0_109 = arith.constant 0 : index
      %97 = vector.load %arg19[%96, %c0_109] : memref<16x128xf32, #tpu.memory_space<vmem>>, vector<1x128xf32>
      tpu.vector_store %arg19[%96, %c0_109], %95 {strides = array<i32>} : memref<16x128xf32, #tpu.memory_space<vmem>>, vector<1x128xf32>,
    }
    %c16_i32_83 = arith.constant 16 : i32
    %c0_84 = arith.constant 0 : index
    %c0_85 = arith.constant 0 : index
    %60 = vector.load %arg0[%c0_84, %c0_85] : memref<16x128xbf16, #tpu.memory_space<vmem>>, vector<16x128xbf16>
    %c0_86 = arith.constant 0 : index
    %c0_87 = arith.constant 0 : index
    %61 = vector.load %arg9[%c0_86, %c0_87] : memref<128x128xbf16, #tpu.memory_space<vmem>>, vector<128x128xbf16>
    %cst_88 = arith.constant dense<0.000000e+00> : vector<16x128xf32>
    %62 = tpu.matmul %60, %61, %cst_88 {dimension_numbers = #tpu.dot_dimension_numbers<[1], [0], [0], [1], [0, 0, 1, 1], [], []>} : vector<16x128xbf16>, vector<128x128xbf16>, vector<16x128xf32> -> vector<16x128xf32>
    %c0_89 = arith.constant 0 : index
    %c0_90 = arith.constant 0 : index
    %63 = vector.load %arg19[%c0_89, %c0_90] : memref<16x128xf32, #tpu.memory_space<vmem>>, vector<16x128xf32>
    %64 = arith.truncf %63 : vector<16x128xf32> to vector<16x128xbf16>
    %c0_91 = arith.constant 0 : index
    %c0_92 = arith.constant 0 : index
    %65 = vector.load %arg10[%c0_91, %c0_92] : memref<128x128xbf16, #tpu.memory_space<vmem>>, vector<128x128xbf16>
    %cst_93 = arith.constant dense<0.000000e+00> : vector<16x128xf32>
    %66 = tpu.matmul %64, %65, %cst_93 {dimension_numbers = #tpu.dot_dimension_numbers<[1], [0], [0], [1], [0, 0, 1, 1], [], []>} : vector<16x128xbf16>, vector<128x128xbf16>, vector<16x128xf32> -> vector<16x128xf32>
    %67 = arith.addf %62, %66 : vector<16x128xf32>
    %c0_94 = arith.constant 0 : index
    %c0_95 = arith.constant 0 : index
    %68 = vector.load %arg11[%c0_94, %c0_95] : memref<1x128xf32, #tpu.memory_space<vmem>>, vector<1x128xf32>
    %69 = vector.broadcast %68 : vector<1x128xf32> to vector<16x128xf32>
    %70 = arith.addf %67, %69 : vector<16x128xf32>
    %cst_96 = arith.constant 0.000000e+00 : f32
    %71 = vector.broadcast %cst_96 : f32 to vector<16x128xf32>
    %72 = arith.maximumf %70, %71 : vector<16x128xf32>
    %c0_97 = arith.constant 0 : index
    %c0_98 = arith.constant 0 : index
    %73 = vector.load %arg5[%c0_97, %c0_98] : memref<8x16xbf16, #tpu.memory_space<vmem>>, vector<8x16xbf16>
    %74 = arith.truncf %72 : vector<16x128xf32> to vector<16x128xbf16>
    %cst_99 = arith.constant dense<0.000000e+00> : vector<8x128xf32>
    %75 = tpu.matmul %73, %74, %cst_99 {dimension_numbers = #tpu.dot_dimension_numbers<[1], [0], [0], [1], [0, 0, 1, 1], [], []>} : vector<8x16xbf16>, vector<16x128xbf16>, vector<8x128xf32> -> vector<8x128xf32>
    %c0_100 = arith.constant 0 : index
    %c0_101 = arith.constant 0 : index
    %76 = vector.load %arg6[%c0_100, %c0_101] : memref<8x1xf32, #tpu.memory_space<vmem>>, vector<8x1xf32>
    %77 = vector.broadcast %76 : vector<8x1xf32> to vector<8x128xf32>
    %78 = arith.mulf %75, %77 : vector<8x128xf32>
    %c0_102 = arith.constant 0 : index
    %c0_103 = arith.constant 0 : index
    %79 = vector.load %arg12[%c0_102, %c0_103] : memref<8x128xf32, #tpu.memory_space<vmem>>, vector<8x128xf32>
    tpu.vector_store %arg12[%c0_102, %c0_103], %78 {strides = array<i32>} : memref<8x128xf32, #tpu.memory_space<vmem>>, vector<8x128xf32>,
    return
  }
}

</mosaic_0001>

<bundles_post_ra>
// kernel: tpu_custom_call.1
= control target key start
LH: loop header
LB: loop body
LE: loop exit
PB: predicated region body
PF: predicated region fallthrough
CT: control target
= control target key end

     0   :  { %17 = vsyncpa [#allocation10], 0  ;;  %s1998_s0 = inlined_call_operand.vmem [shape: bf16[16,128], index: 0, kind: input, shape index: {}]   ;;  %s1999_s1 = inlined_call_operand.hbm [shape: bf16[16,128], index: 1, kind: input, shape index: {}]   ;;  %s2000_s2 = inlined_call_operand.vmem [shape: bf16[16,128], index: 2, kind: input, shape index: {}]   ;;  %s2001_s3 = inlined_call_operand.hbm [shape: s32[16], index: 3, kind: input, shape index: {}]   ;;  %s2002_s4 = inlined_call_operand.vmem [shape: s32[16], index: 4, kind: input, shape index: {}]   ;;  %s2003_s5 = inlined_call_operand.vmem [shape: bf16[8,16], index: 5, kind: input, shape index: {}]   ;;  %s2004_s6 = inlined_call_operand.vmem [shape: f32[8,1], index: 6, kind: input, shape index: {}]   ;;  %s2005_s7 = inlined_call_operand.hbm [shape: bf16[128,128], index: 7, kind: input, shape index: {}]   ;;  %s2006_s8 = inlined_call_operand.hbm [shape: bf16[128,128], index: 8, kind: input, shape index: {}]   ;;  %s2007_s9 = inlined_call_operand.hbm [shape: bf16[128,128], index: 9, kind: input, shape index: {}]   ;;  %s2008_s10 = inlined_call_operand.hbm [shape: bf16[128,128], index: 10, kind: input, shape index: {}]   ;;  %s2009_s11 = inlined_call_operand.vmem [shape: f32[1,128], index: 11, kind: input, shape index: {}]   ;;  %s2010_s12 = inlined_call_operand.hbm [shape: f32[8,128], index: 12, kind: output, shape index: {}]  }
   0x1   :  { %18 = vsyncpa [#allocation12], 0 }
   0x2   :  { %19 = vsyncpa [#allocation13], 0 }
   0x3   :  { %20 = vsyncpa [#allocation17], 0 }
   0x4   :  { %21 = vsyncpa [#allocation20], 0 }
   0x5   :  { %22 = vsyncpa [#allocation11], 0  ;;  %s1700_s21 = smov [#allocation16]   ;;  %s1701_s23 = smov [#allocation19]  }
   0x6   :  { %s66_s22 = sshll.u32 %s1700_s21, 4  ;;  %s90_s24 = sshll.u32 %s1701_s23, 4  ;;  %s67_s22 = int_to_ptr.vmem [resolvable:$true] %s66_s22  ;;  %s1778_s24 = int_to_ptr.vmem [resolvable:$true] %s90_s24 }
   0x7   :  { %s1494_s27 = scalar_lea.hbm %s2005_s7, 1024 }
   0x8   :  { %p1495_p0 = scmp.ne.s32.totalorder %s2005_s7, %s1494_s27  ;;  %p1498_p1 = scmp.lt.u32.totalorder %s1494_s27, %s2005_s7 }
   0xa   :  { %p1500_p2 = pnand %p1498_p1, %p1495_p0 }
   0xc   :  { %1503 = shalt.err (!%p1500_p2)
}
   0xd   :  { %s1504_s14 = scalar_lea.vmem %s67_s22, 1024  ;;  %p1509_p4 = scmp.lt.s32.totalorder %s67_s22, %s67_s22 }
   0xe   :  { %p1505_p3 = scmp.ne.s32.totalorder %s67_s22, %s1504_s14  ;;  %p1510_p5 = scmp.lt.s32.totalorder %s1504_s14, %s1504_s14 }
  0x10   :  { %p1511_p6 = por %p1510_p5, %p1509_p4 }
  0x12   :  { %p1512_p7 = pnand %p1511_p6, %p1505_p3 }
  0x14   :  { %1515 = shalt.err (!%p1512_p7)
}
  0x15   :  { %s1702_s15 = smov 64   ;;  %s1703_s16 = smov 4  }
  0x16   :  { %72 = dma.hbm_to_vmem [thread:$0]  %s2005_s7, 1024, %s67_s22, [#allocation17], %s1702_s15, %s1702_s15, %s1703_s16  }
  0x17   :  { %s1516_s21 = scalar_lea.hbm %s2007_s9, 1024 }
  0x18   :  { %p1517_p8 = scmp.ne.s32.totalorder %s2007_s9, %s1516_s21  ;;  %p1520_p9 = scmp.lt.u32.totalorder %s1516_s21, %s2007_s9 }
  0x1a   :  { %p1522_p10 = pnand %p1520_p9, %p1517_p8 }
  0x1c   :  { %1525 = shalt.err (!%p1522_p10)
}
  0x1d   :  { %s1526_s28 = scalar_lea.vmem %s1778_s24, 1024  ;;  %p1531_p12 = scmp.lt.s32.totalorder %s1778_s24, %s1778_s24 }
  0x1e   :  { %p1527_p11 = scmp.ne.s32.totalorder %s1778_s24, %s1526_s28  ;;  %p1532_p13 = scmp.lt.s32.totalorder %s1526_s28, %s1526_s28 }
  0x20   :  { %p1533_p0 = por %p1532_p13, %p1531_p12 }
  0x22   :  { %p1534_p1 = pnand %p1533_p0, %p1527_p11 }
  0x24   :  { %1537 = shalt.err (!%p1534_p1)
}
  0x25   :  { %96 = dma.hbm_to_vmem [thread:$0]  %s2007_s9, 1024, %s1778_s24, [#allocation20], %s1702_s15, %s1702_s15, %s1703_s16  }
  0x26   :  { %s1704_s29 = smov [#allocation9]   ;;  %s53_s17 = sshll.u32 %s2002_s4, 4  ;;  %s1818_s17 = int_to_ptr.vmem [resolvable:$true] %s53_s17 }
  0x27   :  { %s30_s30 = sshll.u32 %s1704_s29, 4  ;;  %s1538_s20 = scalar_lea.hbm %s1999_s1, 128  ;;  %s31_s30 = int_to_ptr.vmem [resolvable:$true] %s30_s30 }
  0x28   :  { %p1539_p2 = scmp.ne.s32.totalorder %s1999_s1, %s1538_s20  ;;  %p1542_p3 = scmp.lt.u32.totalorder %s1538_s20, %s1999_s1 }
  0x2a   :  { %p1544_p4 = pnand %p1542_p3, %p1539_p2 }
  0x2c   :  { %1547 = shalt.err (!%p1544_p4)
}
  0x2d   :  { %s1548_s9 = scalar_lea.vmem %s31_s30, 128  ;;  %p1553_p6 = scmp.lt.s32.totalorder %s31_s30, %s31_s30 }
  0x2e   :  { %p1549_p5 = scmp.ne.s32.totalorder %s31_s30, %s1548_s9  ;;  %p1554_p7 = scmp.lt.s32.totalorder %s1548_s9, %s1548_s9 }
  0x30   :  { %p1555_p8 = por %p1554_p7, %p1553_p6 }
  0x32   :  { %p1556_p9 = pnand %p1555_p8, %p1549_p5 }
  0x34   :  { %1559 = shalt.err (!%p1556_p9)
}
  0x35   :  { %36 = dma.hbm_to_vmem [thread:$0]  %s1999_s1, 128, %s31_s30, [#allocation10], %s1702_s15, %s1702_s15, %s1703_s16  }
  0x36   :  { %s1560_s7 = scalar_lea.hbm %s2001_s3, 16 }
  0x37   :  { %p1561_p10 = scmp.ne.s32.totalorder %s2001_s3, %s1560_s7  ;;  %p1564_p11 = scmp.lt.u32.totalorder %s1560_s7, %s2001_s3 }
  0x39   :  { %p1566_p12 = pnand %p1564_p11, %p1561_p10 }
  0x3b   :  { %1569 = shalt.err (!%p1566_p12)
}
  0x3c   :  { %s1705_s18 = smov [#allocation14]   ;;  %s1570_s1 = scalar_lea.vmem %s1818_s17, 16 }
  0x3d   :  { %46 = dma.hbm_to_smem %s2001_s3, 16, %s1705_s18, [#allocation12]  }
  0x3e   :  { %p1571_p13 = scmp.ne.s32.totalorder %s1818_s17, %s1570_s1  ;;  %p1575_p0 = scmp.lt.s32.totalorder %s1818_s17, %s1818_s17 }
  0x3f   :  { %p1576_p1 = scmp.lt.s32.totalorder %s1570_s1, %s1570_s1 }
  0x41   :  { %p1577_p2 = por %p1576_p1, %p1575_p0 }
  0x43   :  { %p1578_p3 = pnand %p1577_p2, %p1571_p13 }
  0x45   :  { %1581 = shalt.err (!%p1578_p3)
}
  0x46   :  { %s1706_s30 = smov [#allocation15]   ;;  %s1707_s21 = smov [#allocation18]  }
  0x47   :  { %56 = dma.vmem_to_smem %s1818_s17, 16, %s1706_s30, [#allocation13]  }
  0x48   :  { %s78_s23 = sshll.u32 %s1707_s21, 4  ;;  %s1708_s25 = smov [#allocation21]   ;;  %s79_s23 = int_to_ptr.vmem [resolvable:$true] %s78_s23 }
  0x49   :  { %s102_s26 = sshll.u32 %s1708_s25, 4  ;;  %s1582_s3 = scalar_lea.hbm %s2006_s8, 1024  ;;  %s103_s26 = int_to_ptr.vmem [resolvable:$true] %s102_s26 }
  0x4a   :  { %p1583_p4 = scmp.ne.s32.totalorder %s2006_s8, %s1582_s3  ;;  %p1586_p5 = scmp.lt.u32.totalorder %s1582_s3, %s2006_s8 }
  0x4c   :  { %p1588_p6 = pnand %p1586_p5, %p1583_p4 }
  0x4e   :  { %1591 = shalt.err (!%p1588_p6)
}
  0x4f   :  { %s1592_s17 = scalar_lea.vmem %s79_s23, 1024  ;;  %p1597_p8 = scmp.lt.s32.totalorder %s79_s23, %s79_s23 }
  0x50   :  { %p1593_p7 = scmp.ne.s32.totalorder %s79_s23, %s1592_s17  ;;  %p1598_p9 = scmp.lt.s32.totalorder %s1592_s17, %s1592_s17 }
  0x52   :  { %p1599_p10 = por %p1598_p9, %p1597_p8 }
  0x54   :  { %p1600_p11 = pnand %p1599_p10, %p1593_p7 }
  0x56   :  { %1603 = shalt.err (!%p1600_p11)
}
  0x57   :  { %84 = dma.hbm_to_vmem [thread:$0]  %s2006_s8, 1024, %s79_s23, [#allocation17], %s1702_s15, %s1702_s15, %s1703_s16  }
  0x58   :  { %s1604_s18 = scalar_lea.hbm %s2008_s10, 1024 }
  0x59   :  { %p1605_p12 = scmp.ne.s32.totalorder %s2008_s10, %s1604_s18  ;;  %p1608_p13 = scmp.lt.u32.totalorder %s1604_s18, %s2008_s10 }
  0x5b   :  { %p1610_p0 = pnand %p1608_p13, %p1605_p12 }
  0x5d   :  { %1613 = shalt.err (!%p1610_p0)
}
  0x5e   :  { %s1614_s21 = scalar_lea.vmem %s103_s26, 1024  ;;  %p1619_p2 = scmp.lt.s32.totalorder %s103_s26, %s103_s26 }
  0x5f   :  { %p1615_p1 = scmp.ne.s32.totalorder %s103_s26, %s1614_s21  ;;  %p1620_p3 = scmp.lt.s32.totalorder %s1614_s21, %s1614_s21 }
  0x61   :  { %p1621_p4 = por %p1620_p3, %p1619_p2 }
  0x63   :  { %p1622_p5 = pnand %p1621_p4, %p1615_p1 }
  0x65   :  { %1625 = shalt.err (!%p1622_p5)
}
  0x66   :  { %108 = dma.hbm_to_vmem [thread:$0]  %s2008_s10, 1024, %s103_s26, [#allocation20], %s1702_s15, %s1702_s15, %s1703_s16  }
  0x67   :  { %1668 = dma.done.wait [#allocation10], 128  }
  0x68   :  { %1669 = vsyncadd [#allocation10], 4294967168 }
  0x69   :  { %1670 = dma.done.wait [#allocation12], 16  }
  0x6a   :  { %1671 = vsyncadd [#allocation12], 4294967280 }
  0x6b   :  { %1672 = dma.done.wait [#allocation13], 16  }
  0x6c   :  { %1673 = vsyncadd [#allocation13], 4294967280 }
  0x6d   :  { %1674 = dma.done.wait [#allocation17], 2048  }
  0x6e   :  { %1675 = vsyncadd [#allocation17], 4294965248 }
  0x6f   :  { %1676 = dma.done.wait [#allocation20], 2048  }
  0x70   :  { %1677 = vsyncadd [#allocation20], 4294965248 }
  0x71   :  { %132 = sfence }
  0x72   :  { %v1450_v0 = vld [vmem:[#allocation16] sm:$0xff]   ;;  %v1709_v1 = vmov 0.0   ;;  %v1451_v2 = vld [vmem:[#allocation16 + $0x8] sm:$0xff]   ;;  %vm1710_vm0 = vmmov 0   ;;  %v1452_v3 = vld [vmem:[#allocation16 + $0x10] sm:$0xff]  }
  0x73   :  { %1231 = vmatprep.subr.bf16.mxu0 %v1709_v1  ;;  %312 = vst [vmem:[#allocation8] sm:$0xff] %v1709_v1  ;;  %313 = vst [vmem:[#allocation8 + $0x8] sm:$0xff] %v1709_v1  ;;  %1251 = vmatprep.subr.bf16.mxu1 %v1709_v1  ;;  %v1453_v4 = vld [vmem:[#allocation16 + $0x18] sm:$0xff]   ;;  %v1454_v5 = vld [vmem:[#allocation16 + $0x20] sm:$0xff]  }
  0x74   :  { %1232 = vmatpush3.bf16.msra.mxu0 %v1450_v0  ;;  %1252 = vmatpush3.bf16.msra.mxu1 %v1450_v0  ;;  %v1455_v6 = vld [vmem:[#allocation16 + $0x28] sm:$0xff]   ;;  %v1456_v7 = vld [vmem:[#allocation16 + $0x30] sm:$0xff]   ;;  %v1457_v8 = vld [vmem:[#allocation16 + $0x38] sm:$0xff]  }
  0x75   :  { %1233 = vmatprep.subr.bf16.mxu0 %v1709_v1  ;;  %1253 = vmatprep.subr.bf16.mxu1 %v1709_v1  ;;  %v1458_v9 = vld [vmem:[#allocation9] sm:$0xff]   ;;  %v1459_v10 = vld [vmem:[%s2000_s2] sm:$0xff]   ;;  %s1680_s2 = smov 0  }
  0x76   :  { %1247 = vmatprep.mubr.msk.bf16.mxu0 %vm1710_vm0, %v1709_v1  ;;  %1267 = vmatprep.mubr.msk.bf16.mxu1 %vm1710_vm0, %v1709_v1 }
  0x78   :  { %1234 = vmatpush3.bf16.msra.mxu0 %v1451_v2  ;;  %1254 = vmatpush3.bf16.msra.mxu1 %v1451_v2 }
  0x79   :  { %1235 = vmatprep.subr.bf16.mxu0 %v1709_v1  ;;  %1255 = vmatprep.subr.bf16.mxu1 %v1709_v1 }
  0x7c   :  { %1236 = vmatpush3.bf16.msra.mxu0 %v1452_v3  ;;  %1256 = vmatpush3.bf16.msra.mxu1 %v1452_v3 }
  0x7d   :  { %1237 = vmatprep.subr.bf16.mxu0 %v1709_v1  ;;  %1257 = vmatprep.subr.bf16.mxu1 %v1709_v1 }
  0x80   :  { %1238 = vmatpush3.bf16.msra.mxu0 %v1453_v4  ;;  %1258 = vmatpush3.bf16.msra.mxu1 %v1453_v4 }
  0x81   :  { %1239 = vmatprep.subr.bf16.mxu0 %v1709_v1  ;;  %1259 = vmatprep.subr.bf16.mxu1 %v1709_v1 }
  0x84   :  { %1240 = vmatpush3.bf16.msra.mxu0 %v1454_v5  ;;  %1260 = vmatpush3.bf16.msra.mxu1 %v1454_v5 }
  0x85   :  { %1241 = vmatprep.subr.bf16.mxu0 %v1709_v1  ;;  %1261 = vmatprep.subr.bf16.mxu1 %v1709_v1 }
  0x88   :  { %1242 = vmatpush3.bf16.msra.mxu0 %v1455_v6  ;;  %1262 = vmatpush3.bf16.msra.mxu1 %v1455_v6 }
  0x89   :  { %1243 = vmatprep.subr.bf16.mxu0 %v1709_v1  ;;  %1263 = vmatprep.subr.bf16.mxu1 %v1709_v1 }
  0x8c   :  { %1244 = vmatpush3.bf16.msra.mxu0 %v1456_v7  ;;  %1264 = vmatpush3.bf16.msra.mxu1 %v1456_v7 }
  0x8d   :  { %1245 = vmatprep.subr.bf16.mxu0 %v1709_v1  ;;  %1265 = vmatprep.subr.bf16.mxu1 %v1709_v1 }
  0x90   :  { %1246 = vmatpush3.bf16.msra.mxu0 %v1457_v8  ;;  %1266 = vmatpush3.bf16.msra.mxu1 %v1457_v8 }
  0x93   :  { %1248 = vmatmul.mubr.bf16.vlgmr.msra.gmra.mrb[0].mxu0 %v1458_v9  ;;  %1268 = vmatmul.mubr.bf16.vlgmr.msra.gmra.mrb[0].mxu1 %v1459_v10 }
 0x166   :  { %v240_v11 = vpop.f32.mrb[0].mxu0  ;;  %v291_v12 = vpop.f32.mrb[0].mxu1 }
 0x167   :  { %247 = vst [vmem:[#allocation2] sm:$0xff] %v240_v11  ;;  %v302_v13 = vmax.f32 %v240_v11, 0.0  ;;  %298 = vst [vmem:[#allocation3] sm:$0xff] %v291_v12  ;;  %v308_v14 = vmax.f32 %v291_v12, 0.0  ;;  %v1249_v15 = vpop.f32.mrb[1].mxu0  ;;  %v1269_v16 = vpop.f32.mrb[1].mxu1 }
 0x168   :  { %v243_v17 = vpop.f32.mrb[2].mxu0  ;;  %v294_v18 = vpop.f32.mrb[2].mxu1 }
 0x169   :  { %304 = vst [vmem:[#allocation4] sm:$0xff] %v302_v13  ;;  %310 = vst [vmem:[#allocation5] sm:$0xff] %v308_v14  ;;  %v303_v19 = vmax.f32 %v243_v17, 0.0  ;;  %v309_v20 = vmax.f32 %v294_v18, 0.0  ;;  %v1250_v21 = vpop.f32.mrb[3].mxu0  ;;  %v1270_v22 = vpop.f32.mrb[3].mxu1 }
 0x16a   :  { %248 = vst [vmem:[#allocation2 + $0x8] sm:$0xff] %v243_v17  ;;  %299 = vst [vmem:[#allocation3 + $0x8] sm:$0xff] %v294_v18 }
 0x16b   :  { %305 = vst [vmem:[#allocation4 + $0x8] sm:$0xff] %v303_v19  ;;  %311 = vst [vmem:[#allocation5 + $0x8] sm:$0xff] %v309_v20 }
 0x16c LB: > { %s320_s16 = sld [smem:[#allocation14 + %s1682_s2]]  ;;  %s324_s25 = scalar_lea.vmem [#allocation4], %s1682_s2  ;;  %s1682_s2 = sphi %s1680_s2, %s319_s2  }
 0x16d   : > { %s321_s26 = sld [smem:[#allocation15 + %s1682_s2]]  ;;  %s330_s4 = scalar_lea.vmem [#allocation5], %s1682_s2 }
 0x16e   : > { %s319_s2 = sadd.s32 1, %s1682_s2  }
 0x16f   : > { %p316_p6 = scmp.ge.s32.totalorder %s319_s2, 16  }
 0x170   :  { %s1684_s24 = smov (%p316_p6), 0  }
 0x172   : > { %v325_v23 = vld [vmem:[%s324_s25] sm:$0x1]  ;;  %s322_s9 = scalar_lea.vmem [#allocation8], %s320_s16 }
 0x173   : > { %v323_v24 = vld [vmem:[%s322_s9] sm:$0x1]  ;;  %s328_s3 = scalar_lea.vmem [#allocation8], %s321_s26 }
 0x174   : > { %v326_v25 = vadd.f32 %v325_v23, %v323_v24  ;;  %v331_v26 = vld [vmem:[%s330_s4] sm:$0x1] }
 0x176   : > { %327 = vst [vmem:[%s322_s9] sm:$0x1] %v326_v25 }
 0x17a   :  { %318 = sbr.rel (!%p316_p6) target bundleno = 364 (0x16c), region = 155 }
 0x17d   : > { %v329_v27 = vld [vmem:[%s328_s3] sm:$0x1] }
 0x17e   : > { %v332_v28 = vadd.f32 %v331_v26, %v329_v27 }
 0x180   : > { %333 = vst [vmem:[%s328_s3] sm:$0x1] %v332_v28 }
 0x181 LB: > { %s340_s27 = sld [smem:[#allocation14 + %s1686_s24]]  ;;  %s344_s7 = scalar_lea.vmem [#allocation4], %s1686_s24  ;;  %s1686_s24 = sphi %s1684_s24, %s339_s24  }
 0x182   : > { %s341_s28 = sld [smem:[#allocation15 + %s1686_s24]]  ;;  %v345_v29 = vld [vmem:[%s344_s7] sm:$0x1]  ;;  %s351_s17 = scalar_lea.vmem [#allocation5], %s1686_s24 }
 0x183   : > { %v352_v30 = vld [vmem:[%s351_s17] sm:$0x1]  ;;  %s347_s13 = scalar_lea.vmem [#allocation6], %s1686_s24  ;;  %s354_s14 = scalar_lea.vmem [#allocation7], %s1686_s24 }
 0x184   : > { %s339_s24 = sadd.s32 1, %s1686_s24  }
 0x185   : > { %p336_p7 = scmp.ge.s32.totalorder %s339_s24, 16  }
 0x186   :  { %1271 = vmatprep.subr.bf16.mxu0 (%p336_p7), %v1709_v1  ;;  %1291 = vmatprep.subr.bf16.mxu1 (%p336_p7), %v1709_v1  ;;  %v1460_v35 = vld [vmem:[#allocation18] sm:$0xff] (%p336_p7)   ;;  %v1461_v36 = vld [vmem:[#allocation18 + $0x8] sm:$0xff] (%p336_p7)   ;;  %v1462_v37 = vld [vmem:[#allocation18 + $0x10] sm:$0xff] (%p336_p7)   ;;  %s1688_s18 = smov (%p336_p7), 0  }
 0x187   : > { %s342_s22 = scalar_lea.vmem [#allocation8], %s340_s27  ;;  %338 = sbr.rel (!%p336_p7) target bundleno = 385 (0x181), region = 166  ;;  %1287 = vmatprep.mubr.msk.bf16.mxu0 (%p336_p7), %vm1710_vm0, %v1709_v1  ;;  %1307 = vmatprep.mubr.msk.bf16.mxu1 (%p336_p7), %vm1710_vm0, %v1709_v1  ;;  %v1463_v38 = vld [vmem:[#allocation18 + $0x18] sm:$0xff] (%p336_p7)   ;;  %v1464_v39 = vld [vmem:[#allocation18 + $0x20] sm:$0xff] (%p336_p7)   ;;  %v1465_v40 = vld [vmem:[#allocation18 + $0x28] sm:$0xff] (%p336_p7)  }
 0x188   : > { %v343_v31 = vld [vmem:[%s342_s22] sm:$0x1]  ;;  %s349_s29 = scalar_lea.vmem [#allocation8], %s341_s28  ;;  %1272 = vmatpush3.bf16.msra.mxu0 (%p336_p7), %v1460_v35  ;;  %1292 = vmatpush3.bf16.msra.mxu1 (%p336_p7), %v1460_v35  ;;  %v1466_v41 = vld [vmem:[#allocation18 + $0x30] sm:$0xff] (%p336_p7)   ;;  %v1467_v42 = vld [vmem:[#allocation18 + $0x38] sm:$0xff] (%p336_p7)  }
 0x189   : > { %v346_v32 = vsub.f32 %v343_v31, %v345_v29  ;;  %v350_v33 = vld [vmem:[%s349_s29] sm:$0x1]  ;;  %1273 = vmatprep.subr.bf16.mxu0 (%p336_p7), %v1709_v1  ;;  %1293 = vmatprep.subr.bf16.mxu1 (%p336_p7), %v1709_v1  ;;  %v472_v50 = vld [vmem:[#allocation3] sm:$0xff] (%p336_p7)  ;;  %v373_v53 = vld [vmem:[#allocation2 + $0x8] sm:$0xff] (%p336_p7) }
 0x18a   : > { %v353_v34 = vsub.f32 %v350_v33, %v352_v30  ;;  %524 = vst [vmem:[#allocation8] sm:$0xff] (%p336_p7), %v1709_v1  ;;  %525 = vst [vmem:[#allocation8 + $0x8] sm:$0xff] (%p336_p7), %v1709_v1  ;;  %v372_v49 = vld [vmem:[#allocation2] sm:$0xff] (%p336_p7)  ;;  %v473_v54 = vld [vmem:[#allocation3 + $0x8] sm:$0xff] (%p336_p7) }
 0x18b   : > { %348 = vst [vmem:[%s347_s13] sm:$0x1] %v346_v32 }
 0x18c   : > { %355 = vst [vmem:[%s354_s14] sm:$0x1] %v353_v34  ;;  %1274 = vmatpush3.bf16.msra.mxu0 (%p336_p7), %v1461_v36  ;;  %1294 = vmatpush3.bf16.msra.mxu1 (%p336_p7), %v1461_v36 }
 0x18d   :  { %1275 = vmatprep.subr.bf16.mxu0 (%p336_p7), %v1709_v1  ;;  %1295 = vmatprep.subr.bf16.mxu1 (%p336_p7), %v1709_v1 }
 0x190   :  { %1276 = vmatpush3.bf16.msra.mxu0 %v1462_v37  ;;  %1296 = vmatpush3.bf16.msra.mxu1 %v1462_v37 }
 0x191   :  { %1277 = vmatprep.subr.bf16.mxu0 %v1709_v1  ;;  %1297 = vmatprep.subr.bf16.mxu1 %v1709_v1 }
 0x192   :  { %v474_v45 = vld [vmem:[#allocation6] sm:$0xff]  ;;  %v475_v46 = vld [vmem:[#allocation6 + $0x8] sm:$0xff] }
 0x193   :  { %v374_v43 = vld [vmem:[#allocation7] sm:$0xff]  ;;  %v375_v44 = vld [vmem:[#allocation7 + $0x8] sm:$0xff]  ;;  %v476_v48 = vpack.c.bf16 %v475_v46, %v474_v45 }
 0x194   :  { %1278 = vmatpush3.bf16.msra.mxu0 %v1463_v38  ;;  %1298 = vmatpush3.bf16.msra.mxu1 %v1463_v38  ;;  %v376_v47 = vpack.c.bf16 %v375_v44, %v374_v43 }
 0x195   :  { %1279 = vmatprep.subr.bf16.mxu0 %v1709_v1  ;;  %1299 = vmatprep.subr.bf16.mxu1 %v1709_v1 }
 0x198   :  { %1280 = vmatpush3.bf16.msra.mxu0 %v1464_v39  ;;  %1300 = vmatpush3.bf16.msra.mxu1 %v1464_v39 }
 0x199   :  { %1281 = vmatprep.subr.bf16.mxu0 %v1709_v1  ;;  %1301 = vmatprep.subr.bf16.mxu1 %v1709_v1 }
 0x19c   :  { %1282 = vmatpush3.bf16.msra.mxu0 %v1465_v40  ;;  %1302 = vmatpush3.bf16.msra.mxu1 %v1465_v40 }
 0x19d   :  { %1283 = vmatprep.subr.bf16.mxu0 %v1709_v1  ;;  %1303 = vmatprep.subr.bf16.mxu1 %v1709_v1 }
 0x1a0   :  { %1284 = vmatpush3.bf16.msra.mxu0 %v1466_v41  ;;  %1304 = vmatpush3.bf16.msra.mxu1 %v1466_v41 }
 0x1a1   :  { %1285 = vmatprep.subr.bf16.mxu0 %v1709_v1  ;;  %1305 = vmatprep.subr.bf16.mxu1 %v1709_v1 }
 0x1a4   :  { %1286 = vmatpush3.bf16.msra.mxu0 %v1467_v42  ;;  %1306 = vmatpush3.bf16.msra.mxu1 %v1467_v42 }
 0x1a7   :  { %1288 = vmatmul.mubr.bf16.vlgmr.msra.gmra.mrb[4].mxu0 %v376_v47  ;;  %1308 = vmatmul.mubr.bf16.vlgmr.msra.gmra.mrb[4].mxu1 %v476_v48 }
 0x27a   :  { %v459_v51 = vpop.f32.mrb[4].mxu0  ;;  %v511_v52 = vpop.f32.mrb[4].mxu1 }
 0x27b   :  { %v466_v55 = vadd.f32 %v459_v51, %v372_v49  ;;  %v518_v56 = vadd.f32 %v511_v52, %v472_v50  ;;  %v1289_v57 = vpop.f32.mrb[5].mxu0  ;;  %v1309_v58 = vpop.f32.mrb[5].mxu1 }
 0x27c   :  { %v462_v59 = vpop.f32.mrb[6].mxu0  ;;  %v514_v60 = vpop.f32.mrb[6].mxu1 }
 0x27d   :  { %v468_v61 = vmax.f32 %v466_v55, 0.0  ;;  %v520_v62 = vmax.f32 %v518_v56, 0.0  ;;  %v467_v63 = vadd.f32 %v462_v59, %v373_v53  ;;  %v519_v0 = vadd.f32 %v514_v60, %v473_v54  ;;  %v1290_v2 = vpop.f32.mrb[7].mxu0  ;;  %v1310_v3 = vpop.f32.mrb[7].mxu1 }
 0x27f   :  { %470 = vst [vmem:[#allocation4] sm:$0xff] %v468_v61  ;;  %522 = vst [vmem:[#allocation5] sm:$0xff] %v520_v62  ;;  %v469_v4 = vmax.f32 %v467_v63, 0.0  ;;  %v521_v5 = vmax.f32 %v519_v0, 0.0 }
 0x281   :  { %471 = vst [vmem:[#allocation4 + $0x8] sm:$0xff] %v469_v4  ;;  %523 = vst [vmem:[#allocation5 + $0x8] sm:$0xff] %v521_v5 }
 0x282 LB: > { %s532_s19 = sld [smem:[#allocation14 + %s1690_s18]]  ;;  %s536_s20 = scalar_lea.vmem [#allocation4], %s1690_s18  ;;  %s1690_s18 = sphi %s1688_s18, %s531_s18  }
 0x283   : > { %s533_s1 = sld [smem:[#allocation15 + %s1690_s18]]  ;;  %s542_s21 = scalar_lea.vmem [#allocation5], %s1690_s18 }
 0x284   : > { %s531_s18 = sadd.s32 1, %s1690_s18  }
 0x285   : > { %p528_p8 = scmp.ge.s32.totalorder %s531_s18, 16  }
 0x286   :  { %s1692_s23 = smov (%p528_p8), 0  }
 0x288   : > { %v537_v6 = vld [vmem:[%s536_s20] sm:$0x1]  ;;  %s534_s30 = scalar_lea.vmem [#allocation8], %s532_s19 }
 0x289   : > { %v535_v7 = vld [vmem:[%s534_s30] sm:$0x1]  ;;  %s540_s8 = scalar_lea.vmem [#allocation8], %s533_s1 }
 0x28a   : > { %v538_v8 = vadd.f32 %v537_v6, %v535_v7  ;;  %v543_v9 = vld [vmem:[%s542_s21] sm:$0x1] }
 0x28c   : > { %539 = vst [vmem:[%s534_s30] sm:$0x1] %v538_v8 }
 0x290   :  { %530 = sbr.rel (!%p528_p8) target bundleno = 642 (0x282), region = 177 }
 0x293   : > { %v541_v10 = vld [vmem:[%s540_s8] sm:$0x1] }
 0x294   : > { %v544_v11 = vadd.f32 %v543_v9, %v541_v10 }
 0x296   : > { %545 = vst [vmem:[%s540_s8] sm:$0x1] %v544_v11 }
 0x297 LB: > { %s552_s10 = sld [smem:[#allocation14 + %s1694_s23]]  ;;  %s556_s2 = scalar_lea.vmem [#allocation4], %s1694_s23  ;;  %s1694_s23 = sphi %s1692_s23, %s551_s23  }
 0x298   : > { %s553_s15 = sld [smem:[#allocation15 + %s1694_s23]]  ;;  %v557_v12 = vld [vmem:[%s556_s2] sm:$0x1]  ;;  %s563_s16 = scalar_lea.vmem [#allocation5], %s1694_s23 }
 0x299   : > { %v564_v13 = vld [vmem:[%s563_s16] sm:$0x1]  ;;  %s559_s9 = scalar_lea.vmem [#allocation6], %s1694_s23  ;;  %s566_s4 = scalar_lea.vmem [#allocation7], %s1694_s23 }
 0x29a   : > { %s551_s23 = sadd.s32 1, %s1694_s23  }
 0x29b   : > { %p548_p9 = scmp.ge.s32.totalorder %s551_s23, 16  }
 0x29c   :  { %1311 = vmatprep.subr.bf16.mxu0 (%p548_p9), %v1709_v1  ;;  %1331 = vmatprep.subr.bf16.mxu1 (%p548_p9), %v1709_v1  ;;  %v1468_v18 = vld [vmem:[#allocation18] sm:$0xff] (%p548_p9)   ;;  %v1469_v19 = vld [vmem:[#allocation18 + $0x8] sm:$0xff] (%p548_p9)   ;;  %v1470_v20 = vld [vmem:[#allocation18 + $0x10] sm:$0xff] (%p548_p9)   ;;  %s1696_s3 = smov (%p548_p9), 0  }
 0x29d   : > { %s554_s25 = scalar_lea.vmem [#allocation8], %s552_s10  ;;  %550 = sbr.rel (!%p548_p9) target bundleno = 663 (0x297), region = 188  ;;  %1327 = vmatprep.mubr.msk.bf16.mxu0 (%p548_p9), %vm1710_vm0, %v1709_v1  ;;  %1347 = vmatprep.mubr.msk.bf16.mxu1 (%p548_p9), %vm1710_vm0, %v1709_v1  ;;  %v1471_v21 = vld [vmem:[#allocation18 + $0x18] sm:$0xff] (%p548_p9)   ;;  %v1472_v22 = vld [vmem:[#allocation18 + $0x20] sm:$0xff] (%p548_p9)   ;;  %v1473_v23 = vld [vmem:[#allocation18 + $0x28] sm:$0xff] (%p548_p9)  }
 0x29e   : > { %v555_v14 = vld [vmem:[%s554_s25] sm:$0x1]  ;;  %s561_s26 = scalar_lea.vmem [#allocation8], %s553_s15  ;;  %1312 = vmatpush3.bf16.msra.mxu0 (%p548_p9), %v1468_v18  ;;  %1332 = vmatpush3.bf16.msra.mxu1 (%p548_p9), %v1468_v18  ;;  %v1474_v24 = vld [vmem:[#allocation18 + $0x30] sm:$0xff] (%p548_p9)   ;;  %v1475_v25 = vld [vmem:[#allocation18 + $0x38] sm:$0xff] (%p548_p9)  }
 0x29f   : > { %v558_v15 = vsub.f32 %v555_v14, %v557_v12  ;;  %v562_v16 = vld [vmem:[%s561_s26] sm:$0x1]  ;;  %1313 = vmatprep.subr.bf16.mxu0 (%p548_p9), %v1709_v1  ;;  %1333 = vmatprep.subr.bf16.mxu1 (%p548_p9), %v1709_v1  ;;  %v684_v33 = vld [vmem:[#allocation3] sm:$0xff] (%p548_p9)  ;;  %v585_v36 = vld [vmem:[#allocation2 + $0x8] sm:$0xff] (%p548_p9) }
 0x2a0   : > { %v565_v17 = vsub.f32 %v562_v16, %v564_v13  ;;  %736 = vst [vmem:[#allocation8] sm:$0xff] (%p548_p9), %v1709_v1  ;;  %737 = vst [vmem:[#allocation8 + $0x8] sm:$0xff] (%p548_p9), %v1709_v1  ;;  %v584_v32 = vld [vmem:[#allocation2] sm:$0xff] (%p548_p9)  ;;  %v685_v37 = vld [vmem:[#allocation3 + $0x8] sm:$0xff] (%p548_p9) }
 0x2a1   : > { %560 = vst [vmem:[%s559_s9] sm:$0x1] %v558_v15 }
 0x2a2   : > { %567 = vst [vmem:[%s566_s4] sm:$0x1] %v565_v17  ;;  %1314 = vmatpush3.bf16.msra.mxu0 (%p548_p9), %v1469_v19  ;;  %1334 = vmatpush3.bf16.msra.mxu1 (%p548_p9), %v1469_v19 }
 0x2a3   :  { %1315 = vmatprep.subr.bf16.mxu0 (%p548_p9), %v1709_v1  ;;  %1335 = vmatprep.subr.bf16.mxu1 (%p548_p9), %v1709_v1 }
 0x2a6   :  { %1316 = vmatpush3.bf16.msra.mxu0 %v1470_v20  ;;  %1336 = vmatpush3.bf16.msra.mxu1 %v1470_v20 }
 0x2a7   :  { %1317 = vmatprep.subr.bf16.mxu0 %v1709_v1  ;;  %1337 = vmatprep.subr.bf16.mxu1 %v1709_v1 }
 0x2a8   :  { %v686_v28 = vld [vmem:[#allocation6] sm:$0xff]  ;;  %v687_v29 = vld [vmem:[#allocation6 + $0x8] sm:$0xff] }
 0x2a9   :  { %v586_v26 = vld [vmem:[#allocation7] sm:$0xff]  ;;  %v587_v27 = vld [vmem:[#allocation7 + $0x8] sm:$0xff]  ;;  %v688_v31 = vpack.c.bf16 %v687_v29, %v686_v28 }
 0x2aa   :  { %1318 = vmatpush3.bf16.msra.mxu0 %v1471_v21  ;;  %1338 = vmatpush3.bf16.msra.mxu1 %v1471_v21  ;;  %v588_v30 = vpack.c.bf16 %v587_v27, %v586_v26 }
 0x2ab   :  { %1319 = vmatprep.subr.bf16.mxu0 %v1709_v1  ;;  %1339 = vmatprep.subr.bf16.mxu1 %v1709_v1 }
 0x2ae   :  { %1320 = vmatpush3.bf16.msra.mxu0 %v1472_v22  ;;  %1340 = vmatpush3.bf16.msra.mxu1 %v1472_v22 }
 0x2af   :  { %1321 = vmatprep.subr.bf16.mxu0 %v1709_v1  ;;  %1341 = vmatprep.subr.bf16.mxu1 %v1709_v1 }
 0x2b2   :  { %1322 = vmatpush3.bf16.msra.mxu0 %v1473_v23  ;;  %1342 = vmatpush3.bf16.msra.mxu1 %v1473_v23 }
 0x2b3   :  { %1323 = vmatprep.subr.bf16.mxu0 %v1709_v1  ;;  %1343 = vmatprep.subr.bf16.mxu1 %v1709_v1 }
 0x2b6   :  { %1324 = vmatpush3.bf16.msra.mxu0 %v1474_v24  ;;  %1344 = vmatpush3.bf16.msra.mxu1 %v1474_v24 }
 0x2b7   :  { %1325 = vmatprep.subr.bf16.mxu0 %v1709_v1  ;;  %1345 = vmatprep.subr.bf16.mxu1 %v1709_v1 }
 0x2ba   :  { %1326 = vmatpush3.bf16.msra.mxu0 %v1475_v25  ;;  %1346 = vmatpush3.bf16.msra.mxu1 %v1475_v25 }
 0x2bd   :  { %1328 = vmatmul.mubr.bf16.vlgmr.msra.gmra.mrb[8].mxu0 %v588_v30  ;;  %1348 = vmatmul.mubr.bf16.vlgmr.msra.gmra.mrb[8].mxu1 %v688_v31 }
 0x390   :  { %v671_v34 = vpop.f32.mrb[8].mxu0  ;;  %v723_v35 = vpop.f32.mrb[8].mxu1 }
 0x391   :  { %v678_v38 = vadd.f32 %v671_v34, %v584_v32  ;;  %v730_v39 = vadd.f32 %v723_v35, %v684_v33  ;;  %v1329_v40 = vpop.f32.mrb[9].mxu0  ;;  %v1349_v41 = vpop.f32.mrb[9].mxu1 }
 0x392   :  { %v674_v42 = vpop.f32.mrb[10].mxu0  ;;  %v726_v43 = vpop.f32.mrb[10].mxu1 }
 0x393   :  { %v680_v44 = vmax.f32 %v678_v38, 0.0  ;;  %v732_v45 = vmax.f32 %v730_v39, 0.0  ;;  %v679_v46 = vadd.f32 %v674_v42, %v585_v36  ;;  %v731_v47 = vadd.f32 %v726_v43, %v685_v37  ;;  %v1330_v48 = vpop.f32.mrb[11].mxu0  ;;  %v1350_v49 = vpop.f32.mrb[11].mxu1 }
 0x395   :  { %682 = vst [vmem:[#allocation4] sm:$0xff] %v680_v44  ;;  %734 = vst [vmem:[#allocation5] sm:$0xff] %v732_v45  ;;  %v681_v50 = vmax.f32 %v679_v46, 0.0  ;;  %v733_v51 = vmax.f32 %v731_v47, 0.0 }
 0x397   :  { %683 = vst [vmem:[#allocation4 + $0x8] sm:$0xff] %v681_v50  ;;  %735 = vst [vmem:[#allocation5 + $0x8] sm:$0xff] %v733_v51 }
 0x398 LB: > { %s744_s24 = sld [smem:[#allocation14 + %s1698_s3]]  ;;  %s748_s27 = scalar_lea.vmem [#allocation4], %s1698_s3  ;;  %s1698_s3 = sphi %s1696_s3, %s743_s3  }
 0x399   : > { %s745_s28 = sld [smem:[#allocation15 + %s1698_s3]]  ;;  %s754_s17 = scalar_lea.vmem [#allocation5], %s1698_s3 }
 0x39a   : > { %s743_s3 = sadd.s32 1, %s1698_s3  }
 0x39b   : > { %p740_p10 = scmp.ge.s32.totalorder %s743_s3, 16  }
 0x39c   :  { %1351 = vmatprep.subr.bf16.mxu0 (%p740_p10), %v1709_v1  ;;  %1371 = vmatprep.subr.bf16.mxu1 (%p740_p10), %v1709_v1  ;;  %v1477_v58 = vld [vmem:[#allocation21] sm:$0xff] (%p740_p10)   ;;  %v1479_v60 = vld [vmem:[#allocation21 + $0x8] sm:$0xff] (%p740_p10)   ;;  %v1481_v62 = vld [vmem:[#allocation21 + $0x10] sm:$0xff] (%p740_p10)   ;;  %v1711_v16 = vmov (%p740_p10), 0   ;;  %vm992_vm1 = vcmask (%p740_p10), 130048  }
 0x39d   :  { %v1478_v59 = vld [vmem:[#allocation19] sm:$0xff] (%p740_p10)   ;;  %1367 = vmatprep.mubr.msk.bf16.mxu0 (%p740_p10), %vm1710_vm0, %v1709_v1  ;;  %1387 = vmatprep.mubr.msk.bf16.mxu1 (%p740_p10), %vm1710_vm0, %v1709_v1  ;;  %v1480_v61 = vld [vmem:[#allocation19 + $0x8] sm:$0xff] (%p740_p10)   ;;  %v1482_v63 = vld [vmem:[#allocation19 + $0x10] sm:$0xff] (%p740_p10)  }
 0x39e   : > { %v749_v52 = vld [vmem:[%s748_s27] sm:$0x1]  ;;  %s746_s7 = scalar_lea.vmem [#allocation8], %s744_s24  ;;  %1352 = vmatpush3.bf16.msra.mxu0 (%p740_p10), %v1477_v58  ;;  %1372 = vmatpush3.bf16.msra.mxu1 (%p740_p10), %v1478_v59  ;;  %v1483_v0 = vld [vmem:[#allocation21 + $0x18] sm:$0xff] (%p740_p10)   ;;  %v1485_v3 = vld [vmem:[#allocation21 + $0x20] sm:$0xff] (%p740_p10)  }
 0x39f   : > { %v747_v53 = vld [vmem:[%s746_s7] sm:$0x1]  ;;  %s752_s22 = scalar_lea.vmem [#allocation8], %s745_s28  ;;  %1353 = vmatprep.subr.bf16.mxu0 (%p740_p10), %v1709_v1  ;;  %1373 = vmatprep.subr.bf16.mxu1 (%p740_p10), %v1709_v1  ;;  %v1484_v2 = vld [vmem:[#allocation19 + $0x18] sm:$0xff] (%p740_p10)   ;;  %v1486_v4 = vld [vmem:[#allocation19 + $0x20] sm:$0xff] (%p740_p10)  }
 0x3a0   : > { %v750_v54 = vadd.f32 %v749_v52, %v747_v53  ;;  %v755_v55 = vld [vmem:[%s754_s17] sm:$0x1]  ;;  %v1489_v7 = vld [vmem:[#allocation21 + $0x30] sm:$0xff] (%p740_p10)   ;;  %v1491_v9 = vld [vmem:[#allocation21 + $0x38] sm:$0xff] (%p740_p10)   ;;  %1476 = vset.pattern.permute.xlu0 (%p740_p10), %v1711_v16 }
 0x3a1   :  { %v1487_v5 = vld [vmem:[#allocation21 + $0x28] sm:$0xff] (%p740_p10)   ;;  %v1490_v8 = vld [vmem:[#allocation19 + $0x30] sm:$0xff] (%p740_p10)   ;;  %v1492_v12 = vld [vmem:[#allocation19 + $0x38] sm:$0xff] (%p740_p10)  }
 0x3a2   : > { %751 = vst [vmem:[%s746_s7] sm:$0x1] %v750_v54  ;;  %1354 = vmatpush3.bf16.msra.mxu0 (%p740_p10), %v1479_v60  ;;  %1374 = vmatpush3.bf16.msra.mxu1 (%p740_p10), %v1480_v61  ;;  %v1488_v6 = vld [vmem:[#allocation19 + $0x28] sm:$0xff] (%p740_p10)  }
 0x3a3   :  { %1355 = vmatprep.subr.bf16.mxu0 (%p740_p10), %v1709_v1  ;;  %1375 = vmatprep.subr.bf16.mxu1 (%p740_p10), %v1709_v1  ;;  %v1493_v14 = vld [vmem:[%s1998_s0] sm:$0xff] (%p740_p10)  }
 0x3a4   :  { %v1036_v15 = vld [vmem:[%s2004_s6] sm:$0xff] (%p740_p10) }
 0x3a5   :  { %1039 = vperm.xlu0 (%p740_p10), %1476, %v1036_v15   ;;  %v1155_v19 = vld [vmem:[%s2009_s11] ss:$0 sm:$0xff] (%p740_p10)  ;;  %s1712_s11 = smov (%p740_p10), [#allocation22]  }
 0x3a6   :  { %742 = sbr.rel (!%p740_p10) target bundleno = 920 (0x398), region = 199  ;;  %1356 = vmatpush3.bf16.msra.mxu0 (%p740_p10), %v1481_v62  ;;  %1376 = vmatpush3.bf16.msra.mxu1 (%p740_p10), %v1482_v63  ;;  %v990_v32 = vld [vmem:[%s2003_s5] sm:$0xf] (%p740_p10)  ;;  %s1050_s1 = sshll.u32 (%p740_p10), %s1712_s11, 4  ;;  %s1051_s1 = int_to_ptr.vmem [resolvable:$true] %s1050_s1 }
 0x3a7   :  { %1357 = vmatprep.subr.bf16.mxu0 (%p740_p10), %v1709_v1  ;;  %1377 = vmatprep.subr.bf16.mxu1 (%p740_p10), %v1709_v1  ;;  %s1626_s30 = scalar_lea.vmem (%p740_p10), %s1051_s1, 128  ;;  %p1631_p12 = scmp.lt.s32.totalorder (%p740_p10), %s1051_s1, %s1051_s1 }
 0x3a8   :  { %p1627_p11 = scmp.ne.s32.totalorder (%p740_p10), %s1051_s1, %s1626_s30  ;;  %p1632_p13 = scmp.lt.s32.totalorder (%p740_p10), %s1626_s30, %s1626_s30 }
 0x3a9   : > { %v753_v56 = vld [vmem:[%s752_s22] sm:$0x1] }
 0x3aa   : > { %v756_v57 = vadd.f32 %v755_v55, %v753_v56  ;;  %1358 = vmatpush3.bf16.msra.mxu0 (%p740_p10), %v1483_v0  ;;  %1378 = vmatpush3.bf16.msra.mxu1 (%p740_p10), %v1484_v2  ;;  %p1633_p0 = por (%p740_p10), %p1632_p13, %p1631_p12 }
 0x3ab   :  { %1359 = vmatprep.subr.bf16.mxu0 (%p740_p10), %v1709_v1  ;;  %1379 = vmatprep.subr.bf16.mxu1 (%p740_p10), %v1709_v1 }
 0x3ac   : > { %757 = vst [vmem:[%s752_s22] sm:$0x1] %v756_v57  ;;  %p1634_p1 = pnand (%p740_p10), %p1633_p0, %p1627_p11 }
 0x3ae   :  { %1360 = vmatpush3.bf16.msra.mxu0 %v1485_v3  ;;  %1380 = vmatpush3.bf16.msra.mxu1 %v1486_v4 }
 0x3af   :  { %1361 = vmatprep.subr.bf16.mxu0 %v1709_v1  ;;  %1381 = vmatprep.subr.bf16.mxu1 %v1709_v1 }
 0x3b2   :  { %1362 = vmatpush3.bf16.msra.mxu0 %v1487_v5  ;;  %1382 = vmatpush3.bf16.msra.mxu1 %v1488_v6 }
 0x3b3   :  { %1363 = vmatprep.subr.bf16.mxu0 %v1709_v1  ;;  %1383 = vmatprep.subr.bf16.mxu1 %v1709_v1  ;;  %v776_v10 = vld [vmem:[#allocation8] sm:$0xff]  ;;  %v777_v11 = vld [vmem:[#allocation8 + $0x8] sm:$0xff] }
 0x3b4   :  { %v778_v13 = vpack.c.bf16 %v777_v11, %v776_v10 }
 0x3b6   :  { %1364 = vmatpush3.bf16.msra.mxu0 %v1489_v7  ;;  %1384 = vmatpush3.bf16.msra.mxu1 %v1490_v8 }
 0x3b7   :  { %1365 = vmatprep.subr.bf16.mxu0 %v1709_v1  ;;  %1385 = vmatprep.subr.bf16.mxu1 %v1709_v1 }
 0x3ba   :  { %1366 = vmatpush3.bf16.msra.mxu0 %v1491_v9  ;;  %1386 = vmatpush3.bf16.msra.mxu1 %v1492_v12 }
 0x3bb   :  { %1391 = vmatprep.subr.bf16.mxu0 %v1709_v1 }
 0x3bd   :  { %1368 = vmatmul.mubr.bf16.vlgmr.msra.gmra.mrb[12].mxu0 %v778_v13  ;;  %1388 = vmatmul.mubr.bf16.vlgmr.msra.gmra.mrb[12].mxu1 %v1493_v14 }
 0x3be   :  { %1393 = vmatprep.mubr.msk.bf16.mxu0 %vm1710_vm0, %v1709_v1 }
 0x424   :  { %v1040_v33 = vpop.permute.xlu0 %1039 }
 0x490   :  { %v877_v17 = vpop.f32.mrb[12].mxu0  ;;  %v972_v18 = vpop.f32.mrb[12].mxu1 }
 0x491   :  { %v1369_v20 = vpop.f32.mrb[13].mxu0  ;;  %v973_v21 = vadd.f32 %v972_v18, %v877_v17  ;;  %v1389_v22 = vpop.f32.mrb[13].mxu1 }
 0x492   :  { %v880_v23 = vpop.f32.mrb[14].mxu0  ;;  %v975_v24 = vpop.f32.mrb[14].mxu1 }
 0x493   :  { %v1370_v25 = vpop.f32.mrb[15].mxu0  ;;  %v986_v1 = vadd.f32 %v1155_v19, %v973_v21  ;;  %v976_v26 = vadd.f32 %v975_v24, %v880_v23  ;;  %v1390_v27 = vpop.f32.mrb[15].mxu1 }
 0x495   :  { %v987_v28 = vadd.f32 %v1155_v19, %v976_v26  ;;  %v988_v29 = vmax.f32 %v986_v1, 0.0 }
 0x497   :  { %v989_v30 = vmax.f32 %v987_v28, 0.0 }
 0x499   :  { %v991_v31 = vpack.c.bf16 %v989_v30, %v988_v29 }
 0x49b   :  { %1392 = vmatpush3.bf16.msra.mxu0 %v991_v31 }
 0x49e   :  { %1394 = vmatmul.mubr.msk.bf16.vlgmr.msra.gmra.mrb[16].mxu0 %vm992_vm1, %v990_v32 }
 0x571   :  { %v1030_v34 = vpop.f32.mrb[16].mxu0 }
 0x572   :  { %v1395_v35 = vpop.f32.mrb[17].mxu0  ;;  %v1042_v36 = vmul.f32 %v1040_v33, %v1030_v34 }
 0x573   :  { %v1033_v37 = vpop.f32.mrb[18].mxu0 }
 0x574   :  { %1043 = vst [vmem:[#allocation22] sm:$0xff] %v1042_v36  ;;  %v1396_v38 = vpop.f32.mrb[19].mxu0 }
 0x575   :  { %1637 = shalt.err (!%p1634_p1)
}
 0x576   :  { %s1638_s8 = scalar_lea.hbm %s2010_s12, 128 }
 0x577   :  { %p1639_p2 = scmp.ne.s32.totalorder %s2010_s12, %s1638_s8  ;;  %p1642_p3 = scmp.lt.u32.totalorder %s1638_s8, %s2010_s12 }
 0x579   :  { %p1644_p4 = pnand %p1642_p3, %p1639_p2 }
 0x57b   :  { %1647 = shalt.err (!%p1644_p4)
}
 0x57c   :  { %1053 = dma.vmem_to_hbm [thread:$0]  %s1051_s1, 128, %s2010_s12, [#allocation11]  }
 0x57d   :  { %1678 = dma.done.wait [#allocation11], 128  }
 0x57e   :  { %1679 = vsyncadd [#allocation11], 4294967168 }
 0x57f   :  { %1057 = vsyncpa [#allocation10], 1 }
 0x580   :  { %1058 = vsyncpa [#allocation17], 1 }
 0x581   :  { %1059 = vsyncpa [#allocation20], 1 }
 0x582   :  { %1060 = vsyncpa [#allocation11], 1 }
 0x583   :  { %1061 = vsyncpa [#allocation12], 1 }
 0x584   :  { %1062 = vsyncpa [#allocation13], 1 }

</bundles_post_ra>
